<compile_context>
chip_gen: v6e
topology: v6e:2x2x1
jax: 0.10.0
libtpu: 0.0.40
codegen_flags: <defaults>
</compile_context>

<pallas_src>
import functools

import jax
import jax.numpy as jnp
from jax import lax
from jax.experimental import pallas as pl
from jax.experimental.pallas import tpu as pltpu

LANE = 128        # TPU lane width (last-dim tiling)
SUBLANE = 8       # f32 sublane width (second-to-last-dim tiling)
NEG_BIG = -1e30   # bias for padded logit columns -> exp() underflows to 0
DEFAULT_UNROLL = 8  # timesteps per grid iteration


def _round_up(x, m):
    return ((x + m - 1) // m) * m


def _rnn_seq_kernel(T, K, i_pad, h_pad,
                    x_ref, h0_ref, w_ref, b_ref,
                    out_ref, hfin_ref, comb_ref):
    """One grid iteration == K RNN timesteps.

    x_ref    : (K, B_pad, I_pad)            this block's inputs (compute dtype)
    h0_ref   : (B_pad, H_pad) f32           initial hidden (VMEM resident)
    w_ref    : (I_pad+H_pad, H_pad+O_pad)   fused [x|h]->[hidden|logits] weight (resident)
    b_ref    : (1, H_pad+O_pad) f32         fused bias (resident)
    out_ref  : (K, B_pad, O_pad) f32        log-softmax outputs for this block
    hfin_ref : (B_pad, H_pad) f32           final hidden (resident; written once at t==T-1)
    comb_ref : (B_pad, I_pad+H_pad) VMEM    combined [x|h] MXU operand; its hidden
                                            lanes [I_pad:] are the cross-step carry.
    """
    g = pl.program_id(0)
    b_pad = hfin_ref.shape[0]
    n_pad = w_ref.shape[1]

    @pl.when(g == 0)
    def _():
        comb_ref[:, i_pad:] = h0_ref[...].astype(comb_ref.dtype)

    # Hoisted: broadcast the bias ONCE per grid block (not per unrolled step).
    bias = jnp.broadcast_to(b_ref[...], (b_pad, n_pad))

    def step(k, carry):
        t = g * K + k

        @pl.when(t < T)   # mask timesteps past the real sequence length
        def _():
            comb_ref[:, :i_pad] = x_ref[k]
            # Single fused MXU matmul, f32 accumulation: columns [0:H_pad]
            # are the new hidden, columns [H_pad:] are the logits.
            res = jnp.dot(comb_ref[...], w_ref[...],
                          preferred_element_type=jnp.float32) + bias
            new_h = res[:, :h_pad]                    # (B_pad, H_pad) f32
            logits = res[:, h_pad:]                   # (B_pad, O_pad) f32

            # Numerically-stable log_softmax over lane-padded logits.
            # Padded columns carry a -1e30 bias -> exp underflows to 0, so
            # the real columns match an unpadded log_softmax exactly.
            m = jnp.max(logits, axis=1, keepdims=True)
            z = logits - m
            lse = jnp.log(jnp.sum(jnp.exp(z), axis=1, keepdims=True))
            out_ref[k] = (z - lse).astype(out_ref.dtype)

            # Hidden carry lives in the combined operand's hidden lanes.
            # (Padded batch rows accumulate b_i2h each step; harmless, they
            # are sliced off on the host and never reduced over.)
            comb_ref[:, i_pad:] = new_h.astype(comb_ref.dtype)

            @pl.when(t == T - 1)
            def _():
                hfin_ref[...] = new_h

        return carry

    lax.fori_loop(0, K, step, 0, unroll=True)


def prepare_params(w_i2h, b_i2h, w_i2o, b_i2o, input_size,
                   compute_dtype=jnp.bfloat16):
    """One-time parameter prep: transpose, fuse the two Linears, lane-pad, cast.

    w_i2h : (H, I+H)  PyTorch nn.Linear layout      b_i2h : (H,)
    w_i2o : (O, I+H)                                b_i2o : (O,)
    """
    H = w_i2h.shape[0]
    O = w_i2o.shape[0]
    I = input_size
    assert w_i2h.shape[1] == I + H and w_i2o.shape[1] == I + H

    I_pad = _round_up(I, LANE)
    H_pad = _round_up(H, LANE)
    O_pad = _round_up(O, LANE)
    N_pad = H_pad + O_pad

    w_i2h_t = jnp.transpose(w_i2h).astype(jnp.float32)   # (I+H, H)
    w_i2o_t = jnp.transpose(w_i2o).astype(jnp.float32)   # (I+H, O)

    # Fused weight for the combined [x | h] operand (ONE dot per step).
    # Rows [0:I]            multiply x lanes;  rows [I_pad:I_pad+H] multiply h lanes.
    # Cols [0:H]            produce hidden;    cols [H_pad:H_pad+O] produce logits.
    w = jnp.zeros((I_pad + H_pad, N_pad), jnp.float32)
    w = w.at[:I, :H].set(w_i2h_t[:I])
    w = w.at[:I, H_pad:H_pad + O].set(w_i2o_t[:I])
    w = w.at[I_pad:I_pad + H, :H].set(w_i2h_t[I:])
    w = w.at[I_pad:I_pad + H, H_pad:H_pad + O].set(w_i2o_t[I:])

    # Bias stays f32 (added to the f32 accumulator). Padded hidden cols = 0
    # (keeps the hidden carry's padding at exactly 0); padded logit cols = -1e30.
    b = jnp.full((1, N_pad), NEG_BIG, jnp.float32)
    b = b.at[0, :H_pad].set(0.0)
    b = b.at[0, :H].set(b_i2h.astype(jnp.float32))
    b = b.at[0, H_pad:H_pad + O].set(b_i2o.astype(jnp.float32))

    return dict(w=w.astype(compute_dtype), b=b,
                I=I, H=H, O=O, I_pad=I_pad, H_pad=H_pad, O_pad=O_pad,
                compute_dtype=compute_dtype)


def pad_inputs(x_seq, h0, params, unroll=DEFAULT_UNROLL):
    """Pad/cast inputs once. Hoist/cache this outside the hot path when the
    same sequence is fed repeatedly."""
    T, B, I = x_seq.shape
    assert T >= 1, "empty sequence not supported"
    K = min(unroll, T)
    T_pad = _round_up(T, K)
    B_pad = _round_up(B, SUBLANE)
    cdtype = params["compute_dtype"]

    x_pad = jnp.zeros((T_pad, B_pad, params["I_pad"]), cdtype)
    x_pad = x_pad.at[:T, :B, :I].set(x_seq.astype(cdtype))
    h0_pad = jnp.zeros((B_pad, params["H_pad"]), jnp.float32)
    h0_pad = h0_pad.at[:B, :params["H"]].set(h0.astype(jnp.float32))
    return x_pad, h0_pad, K


def _run_padded(x_pad, h0_pad, params, T, K):
    """Single pallas_call running all T timesteps (K per grid iteration)."""
    T_pad, B_pad, I_pad = x_pad.shape
    H_pad, O_pad = params["H_pad"], params["O_pad"]
    N_pad = H_pad + O_pad
    cdtype = params["compute_dtype"]

    kernel = functools.partial(_rnn_seq_kernel, T, K, I_pad, H_pad)

    return pl.pallas_call(
        kernel,
        out_shape=(
            jax.ShapeDtypeStruct((T_pad, B_pad, O_pad), jnp.float32),
            jax.ShapeDtypeStruct((B_pad, H_pad), jnp.float32),
        ),
        grid_spec=pltpu.PrefetchScalarGridSpec(
            num_scalar_prefetch=0,
            grid=(T_pad // K,),
            in_specs=[
                pl.BlockSpec((K, B_pad, I_pad), lambda g: (g, 0, 0)),      # x block (K steps)
                pl.BlockSpec((B_pad, H_pad), lambda g: (0, 0)),            # h0 (resident)
                pl.BlockSpec((I_pad + H_pad, N_pad), lambda g: (0, 0)),    # fused W (resident)
                pl.BlockSpec((1, N_pad), lambda g: (0, 0)),                # fused bias (resident)
            ],
            out_specs=(
                pl.BlockSpec((K, B_pad, O_pad), lambda g: (g, 0, 0)),      # K-step out slab
                pl.BlockSpec((B_pad, H_pad), lambda g: (0, 0)),            # final hidden
            ),
            scratch_shapes=[pltpu.VMEM((B_pad, I_pad + H_pad), cdtype)],   # combined [x|h]
        ),
        compiler_params=pltpu.CompilerParams(
            # Time axis is a sequential carry -> must stay "arbitrary".
            dimension_semantics=("arbitrary",),
            # Resident footprint ~hundreds of KB; explicit limit keeps us
            # honest when H/O scale (v7x physical ceiling is 64 MiB).
            vmem_limit_bytes=32 * 1024 * 1024,
        ),
    )(x_pad, h0_pad, params["w"], params["b"])


def rnn_simple_sequence(x_seq, h0, params, unroll=DEFAULT_UNROLL):
    """Run T RNN timesteps in ONE pallas_call.

    x_seq : (T, B, I)   h0 : (B, H)
    Returns (out_seq (T, B, O) log-softmax, h_final (B, H)).
    """
    T, B, _ = x_seq.shape
    x_pad, h0_pad, K = pad_inputs(x_seq, h0, params, unroll)
    out_pad, hfin_pad = _run_padded(x_pad, h0_pad, params, T, K)
    return out_pad[:T, :B, :params["O"]], hfin_pad[:B, :params["H"]]


def rnn_simple_forward(x, h, params):
    """Exact equivalent of RNNSimple.forward(input, hidden): one timestep."""
    out_seq, h_new = rnn_simple_sequence(x[None], h, params, unroll=1)
    return out_seq[0], h_new


if __name__ == "__main__":
    B = 2
    INPUT_SIZE = 16
    HIDDEN_SIZE = 32
    OUTPUT_SIZE = 8
    SEQ_LEN = 8

    key = jax.random.PRNGKey(0)
    kx, kw1, kb1, kw2, kb2 = jax.random.split(key, 5)

    fan_in = INPUT_SIZE + HIDDEN_SIZE
    bound = 1.0 / jnp.sqrt(jnp.float32(fan_in))
    w_i2h = jax.random.uniform(kw1, (HIDDEN_SIZE, fan_in), jnp.float32, -bound, bound)
    b_i2h = jax.random.uniform(kb1, (HIDDEN_SIZE,), jnp.float32, -bound, bound)
    w_i2o = jax.random.uniform(kw2, (OUTPUT_SIZE, fan_in), jnp.float32, -bound, bound)
    b_i2o = jax.random.uniform(kb2, (OUTPUT_SIZE,), jnp.float32, -bound, bound)

    x_seq = jax.random.normal(kx, (SEQ_LEN, B, INPUT_SIZE), jnp.float32)
    h0 = jnp.zeros((B, HIDDEN_SIZE), jnp.float32)   # initHidden() broadcast over batch

    # Plain-JAX per-step reference (PyTorch semantics), highest matmul precision.
    def ref_step(h, x):
        combined = jnp.concatenate([x, h], axis=1)
        h_new = jnp.dot(combined, w_i2h.T, precision=lax.Precision.HIGHEST) + b_i2h
        logits = jnp.dot(combined, w_i2o.T, precision=lax.Precision.HIGHEST) + b_i2o
        return h_new, jax.nn.log_softmax(logits, axis=1)

    h_ref = h0
    ref_outs = []
    for t in range(SEQ_LEN):
        h_ref, o_ref = ref_step(h_ref, x_seq[t])
        ref_outs.append(o_ref)
    ref_outs = jnp.stack(ref_outs)
    h1_ref = ref_step(h0, x_seq[0])[0]

    # Verify both the exact f32 config and the recommended bf16-weight config.
    configs = [
        ("float32", jnp.float32, 5e-3),    # tolerance absorbs MXU f32 pass modes
        ("bfloat16", jnp.bfloat16, 1e-1),  # bf16 weights/x, f32 accumulate/softmax
    ]
    for name, cdtype, atol in configs:
        params = prepare_params(w_i2h, b_i2h, w_i2o, b_i2o, INPUT_SIZE,
                                compute_dtype=cdtype)

        # Full sequence in a single kernel launch (time loop on the grid,
        # DEFAULT_UNROLL timesteps per grid iteration).
        out_seq, h_final = rnn_simple_sequence(x_seq, h0, params)
        jax.block_until_ready((out_seq, h_final))

        # Single-step call matching the module's forward signature.
        out0, h1 = rnn_simple_forward(x_seq[0], h0, params)
        jax.block_until_ready((out0, h1))

        assert jnp.allclose(out_seq, ref_outs, atol=atol), f"{name}: sequence output mismatch"
        assert jnp.allclose(h_final, h_ref, atol=atol), f"{name}: final hidden mismatch"
        assert jnp.allclose(out0, ref_outs[0], atol=atol), f"{name}: single-step output mismatch"
        assert jnp.allclose(h1, h1_ref, atol=atol), f"{name}: single-step hidden mismatch"
        # Sanity: log_softmax rows sum to 1 in probability space (softmax in f32).
        assert jnp.allclose(jnp.sum(jnp.exp(out_seq), axis=-1), 1.0, atol=1e-3), \
            f"{name}: softmax normalization broken"

    print("KERNEL_OK")
</pallas_src>

<mosaic_0001>
module attributes {stable_mosaic.version = 11 : i64} {
  func.func @_rnn_seq_kernel(%arg0: i32, %arg1: memref<8x8x128xf32, #tpu.memory_space<vmem>>, %arg2: memref<8x128xf32, #tpu.memory_space<vmem>>, %arg3: memref<256x256xf32, #tpu.memory_space<vmem>>, %arg4: memref<1x256xf32, #tpu.memory_space<vmem>>, %arg5: memref<8x8x128xf32, #tpu.memory_space<vmem>>, %arg6: memref<8x128xf32, #tpu.memory_space<vmem>>, %arg7: memref<8x256xf32, #tpu.memory_space<vmem>>) attributes {dimension_semantics = [#tpu.dimension_semantics<arbitrary>], iteration_bounds = array<i64: 1>, scalar_prefetch = 0 : i64, scratch_operands = 1 : i64, tpu.core_type = #tpu.core_type<tc>, window_params = [{transform_indices = @transform_0, window_bounds = array<i64: 8, 8, 128>}, {pipeline_mode = #tpu.pipeline_mode<synchronous>, transform_indices = @transform_1, window_bounds = array<i64: 8, 128>}, {pipeline_mode = #tpu.pipeline_mode<synchronous>, transform_indices = @transform_2, window_bounds = array<i64: 256, 256>}, {pipeline_mode = #tpu.pipeline_mode<synchronous>, transform_indices = @transform_3, window_bounds = array<i64: 1, 256>}, {transform_indices = @transform_4, window_bounds = array<i64: 8, 8, 128>}, {pipeline_mode = #tpu.pipeline_mode<synchronous>, transform_indices = @transform_5, window_bounds = array<i64: 8, 128>}]} {
    %c0_i32 = arith.constant 0 : i32
    %0 = arith.cmpi eq, %arg0, %c0_i32 : i32
    %1 = arith.extui %0 : i1 to i32
    %c0_i32_0 = arith.constant 0 : i32
    %2 = arith.cmpi ne, %1, %c0_i32_0 : i32
    scf.if %2 {
      %c0_27 = arith.constant 0 : index
      %c0_28 = arith.constant 0 : index
      %46 = vector.load %arg2[%c0_27, %c0_28] : memref<8x128xf32, #tpu.memory_space<vmem>>, vector<8x128xf32>
      %c0_29 = arith.constant 0 : index
      %c128 = arith.constant 128 : index
      %47 = vector.load %arg7[%c0_29, %c128] : memref<8x256xf32, #tpu.memory_space<vmem>>, vector<8x128xf32>
      tpu.vector_store %arg7[%c0_29, %c128], %46 {strides = array<i32>} : memref<8x256xf32, #tpu.memory_space<vmem>>, vector<8x128xf32>,
    } else {
    }
    %c0 = arith.constant 0 : index
    %c0_1 = arith.constant 0 : index
    %3 = vector.load %arg4[%c0, %c0_1] : memref<1x256xf32, #tpu.memory_space<vmem>>, vector<1x256xf32>
    %4 = vector.shape_cast %3 : vector<1x256xf32> to vector<1x256xf32>
    %5 = vector.broadcast %4 : vector<1x256xf32> to vector<8x256xf32>
    %c0_i32_2 = arith.constant 0 : i32
    %c8_i32 = arith.constant 8 : i32
    %6 = arith.muli %arg0, %c8_i32 : i32
    %7 = arith.addi %6, %c0_i32_2 : i32
    %c8_i32_3 = arith.constant 8 : i32
    %8 = arith.cmpi slt, %7, %c8_i32_3 : i32
    %9 = arith.extui %8 : i1 to i32
    %c0_i32_4 = arith.constant 0 : i32
    %10 = arith.cmpi ne, %9, %c0_i32_4 : i32
    scf.if %10 {
      %46 = arith.index_cast %c0_i32_2 : i32 to index
      %c0_27 = arith.constant 0 : index
      %c0_28 = arith.constant 0 : index
      %47 = vector.load %arg1[%46, %c0_27, %c0_28] : memref<8x8x128xf32, #tpu.memory_space<vmem>>, vector<1x8x128xf32>
      %48 = vector.shape_cast %47 : vector<1x8x128xf32> to vector<8x128xf32>
      %c0_29 = arith.constant 0 : index
      %c0_30 = arith.constant 0 : index
      %49 = vector.load %arg7[%c0_29, %c0_30] : memref<8x256xf32, #tpu.memory_space<vmem>>, vector<8x128xf32>
      tpu.vector_store %arg7[%c0_29, %c0_30], %48 {strides = array<i32>} : memref<8x256xf32, #tpu.memory_space<vmem>>, vector<8x128xf32>,
      %c0_31 = arith.constant 0 : index
      %c0_32 = arith.constant 0 : index
      %50 = vector.load %arg7[%c0_31, %c0_32] : memref<8x256xf32, #tpu.memory_space<vmem>>, vector<8x256xf32>
      %c0_33 = arith.constant 0 : index
      %c0_34 = arith.constant 0 : index
      %51 = vector.load %arg3[%c0_33, %c0_34] : memref<256x256xf32, #tpu.memory_space<vmem>>, vector<256x256xf32>
      %cst = arith.constant dense<0.000000e+00> : vector<8x256xf32>
      %52 = tpu.matmul %50, %51, %cst {dimension_numbers = #tpu.dot_dimension_numbers<[1], [0], [0], [1], [0, 0, 1, 1], [], []>} : vector<8x256xf32>, vector<256x256xf32>, vector<8x256xf32> -> vector<8x256xf32>
      %53 = arith.addf %52, %5 : vector<8x256xf32>
      %54 = vector.extract_strided_slice %53 {offsets = [0, 0], sizes = [8, 128], strides = [1, 1]} : vector<8x256xf32> to vector<8x128xf32>
      %55 = vector.extract_strided_slice %53 {offsets = [0, 128], sizes = [8, 128], strides = [1, 1]} : vector<8x256xf32> to vector<8x128xf32>
      %cst_35 = arith.constant dense<0xFF800000> : vector<8xf32>
      %56 = vector.multi_reduction <maximumf>, %55, %cst_35 [1] : vector<8x128xf32> to vector<8xf32>
      %57 = vector.shape_cast %56 : vector<8xf32> to vector<8x1xf32>
      %58 = vector.broadcast %57 : vector<8x1xf32> to vector<8x128xf32>
      %59 = arith.subf %55, %58 : vector<8x128xf32>
      %60 = math.exp %59 : vector<8x128xf32>
      %cst_36 = arith.constant dense<0.000000e+00> : vector<8xf32>
      %61 = vector.multi_reduction <add>, %60, %cst_36 [1] : vector<8x128xf32> to vector<8xf32>
      %62 = vector.shape_cast %61 : vector<8xf32> to vector<8x1xf32>
      %63 = math.log %62 : vector<8x1xf32>
      %64 = vector.broadcast %63 : vector<8x1xf32> to vector<8x128xf32>
      %65 = arith.subf %59, %64 : vector<8x128xf32>
      %66 = arith.index_cast %c0_i32_2 : i32 to index
      %c0_37 = arith.constant 0 : index
      %c0_38 = arith.constant 0 : index
      %67 = vector.load %arg5[%66, %c0_37, %c0_38] : memref<8x8x128xf32, #tpu.memory_space<vmem>>, vector<1x8x128xf32>
      %68 = vector.shape_cast %67 : vector<1x8x128xf32> to vector<8x128xf32>
      %69 = vector.shape_cast %65 : vector<8x128xf32> to vector<1x8x128xf32>
      tpu.vector_store %arg5[%66, %c0_37, %c0_38], %69 {strides = array<i32>} : memref<8x8x128xf32, #tpu.memory_space<vmem>>, vector<1x8x128xf32>,
      %c0_39 = arith.constant 0 : index
      %c128 = arith.constant 128 : index
      %70 = vector.load %arg7[%c0_39, %c128] : memref<8x256xf32, #tpu.memory_space<vmem>>, vector<8x128xf32>
      tpu.vector_store %arg7[%c0_39, %c128], %54 {strides = array<i32>} : memref<8x256xf32, #tpu.memory_space<vmem>>, vector<8x128xf32>,
      %c7_i32_40 = arith.constant 7 : i32
      %71 = arith.cmpi eq, %7, %c7_i32_40 : i32
      %72 = arith.extui %71 : i1 to i32
      %c0_i32_41 = arith.constant 0 : i32
      %73 = arith.cmpi ne, %72, %c0_i32_41 : i32
      scf.if %73 {
        %c0_42 = arith.constant 0 : index
        %c0_43 = arith.constant 0 : index
        %74 = vector.load %arg6[%c0_42, %c0_43] : memref<8x128xf32, #tpu.memory_space<vmem>>, vector<8x128xf32>
        tpu.vector_store %arg6[%c0_42, %c0_43], %54 {strides = array<i32>} : memref<8x128xf32, #tpu.memory_space<vmem>>, vector<8x128xf32>,
      } else {
      }
    } else {
    }
    %c1_i32 = arith.constant 1 : i32
    %c8_i32_5 = arith.constant 8 : i32
    %11 = arith.muli %arg0, %c8_i32_5 : i32
    %12 = arith.addi %11, %c1_i32 : i32
    %c8_i32_6 = arith.constant 8 : i32
    %13 = arith.cmpi slt, %12, %c8_i32_6 : i32
    %14 = arith.extui %13 : i1 to i32
    %c0_i32_7 = arith.constant 0 : i32
    %15 = arith.cmpi ne, %14, %c0_i32_7 : i32
    scf.if %15 {
      %46 = arith.index_cast %c1_i32 : i32 to index
      %c0_27 = arith.constant 0 : index
      %c0_28 = arith.constant 0 : index
      %47 = vector.load %arg1[%46, %c0_27, %c0_28] : memref<8x8x128xf32, #tpu.memory_space<vmem>>, vector<1x8x128xf32>
      %48 = vector.shape_cast %47 : vector<1x8x128xf32> to vector<8x128xf32>
      %c0_29 = arith.constant 0 : index
      %c0_30 = arith.constant 0 : index
      %49 = vector.load %arg7[%c0_29, %c0_30] : memref<8x256xf32, #tpu.memory_space<vmem>>, vector<8x128xf32>
      tpu.vector_store %arg7[%c0_29, %c0_30], %48 {strides = array<i32>} : memref<8x256xf32, #tpu.memory_space<vmem>>, vector<8x128xf32>,
      %c0_31 = arith.constant 0 : index
      %c0_32 = arith.constant 0 : index
      %50 = vector.load %arg7[%c0_31, %c0_32] : memref<8x256xf32, #tpu.memory_space<vmem>>, vector<8x256xf32>
      %c0_33 = arith.constant 0 : index
      %c0_34 = arith.constant 0 : index
      %51 = vector.load %arg3[%c0_33, %c0_34] : memref<256x256xf32, #tpu.memory_space<vmem>>, vector<256x256xf32>
      %cst = arith.constant dense<0.000000e+00> : vector<8x256xf32>
      %52 = tpu.matmul %50, %51, %cst {dimension_numbers = #tpu.dot_dimension_numbers<[1], [0], [0], [1], [0, 0, 1, 1], [], []>} : vector<8x256xf32>, vector<256x256xf32>, vector<8x256xf32> -> vector<8x256xf32>
      %53 = arith.addf %52, %5 : vector<8x256xf32>
      %54 = vector.extract_strided_slice %53 {offsets = [0, 0], sizes = [8, 128], strides = [1, 1]} : vector<8x256xf32> to vector<8x128xf32>
      %55 = vector.extract_strided_slice %53 {offsets = [0, 128], sizes = [8, 128], strides = [1, 1]} : vector<8x256xf32> to vector<8x128xf32>
      %cst_35 = arith.constant dense<0xFF800000> : vector<8xf32>
      %56 = vector.multi_reduction <maximumf>, %55, %cst_35 [1] : vector<8x128xf32> to vector<8xf32>
      %57 = vector.shape_cast %56 : vector<8xf32> to vector<8x1xf32>
      %58 = vector.broadcast %57 : vector<8x1xf32> to vector<8x128xf32>
      %59 = arith.subf %55, %58 : vector<8x128xf32>
      %60 = math.exp %59 : vector<8x128xf32>
      %cst_36 = arith.constant dense<0.000000e+00> : vector<8xf32>
      %61 = vector.multi_reduction <add>, %60, %cst_36 [1] : vector<8x128xf32> to vector<8xf32>
      %62 = vector.shape_cast %61 : vector<8xf32> to vector<8x1xf32>
      %63 = math.log %62 : vector<8x1xf32>
      %64 = vector.broadcast %63 : vector<8x1xf32> to vector<8x128xf32>
      %65 = arith.subf %59, %64 : vector<8x128xf32>
      %66 = arith.index_cast %c1_i32 : i32 to index
      %c0_37 = arith.constant 0 : index
      %c0_38 = arith.constant 0 : index
      %67 = vector.load %arg5[%66, %c0_37, %c0_38] : memref<8x8x128xf32, #tpu.memory_space<vmem>>, vector<1x8x128xf32>
      %68 = vector.shape_cast %67 : vector<1x8x128xf32> to vector<8x128xf32>
      %69 = vector.shape_cast %65 : vector<8x128xf32> to vector<1x8x128xf32>
      tpu.vector_store %arg5[%66, %c0_37, %c0_38], %69 {strides = array<i32>} : memref<8x8x128xf32, #tpu.memory_space<vmem>>, vector<1x8x128xf32>,
      %c0_39 = arith.constant 0 : index
      %c128 = arith.constant 128 : index
      %70 = vector.load %arg7[%c0_39, %c128] : memref<8x256xf32, #tpu.memory_space<vmem>>, vector<8x128xf32>
      tpu.vector_store %arg7[%c0_39, %c128], %54 {strides = array<i32>} : memref<8x256xf32, #tpu.memory_space<vmem>>, vector<8x128xf32>,
      %c7_i32_40 = arith.constant 7 : i32
      %71 = arith.cmpi eq, %12, %c7_i32_40 : i32
      %72 = arith.extui %71 : i1 to i32
      %c0_i32_41 = arith.constant 0 : i32
      %73 = arith.cmpi ne, %72, %c0_i32_41 : i32
      scf.if %73 {
        %c0_42 = arith.constant 0 : index
        %c0_43 = arith.constant 0 : index
        %74 = vector.load %arg6[%c0_42, %c0_43] : memref<8x128xf32, #tpu.memory_space<vmem>>, vector<8x128xf32>
        tpu.vector_store %arg6[%c0_42, %c0_43], %54 {strides = array<i32>} : memref<8x128xf32, #tpu.memory_space<vmem>>, vector<8x128xf32>,
      } else {
      }
    } else {
    }
    %c2_i32 = arith.constant 2 : i32
    %c8_i32_8 = arith.constant 8 : i32
    %16 = arith.muli %arg0, %c8_i32_8 : i32
    %17 = arith.addi %16, %c2_i32 : i32
    %c8_i32_9 = arith.constant 8 : i32
    %18 = arith.cmpi slt, %17, %c8_i32_9 : i32
    %19 = arith.extui %18 : i1 to i32
    %c0_i32_10 = arith.constant 0 : i32
    %20 = arith.cmpi ne, %19, %c0_i32_10 : i32
    scf.if %20 {
      %46 = arith.index_cast %c2_i32 : i32 to index
      %c0_27 = arith.constant 0 : index
      %c0_28 = arith.constant 0 : index
      %47 = vector.load %arg1[%46, %c0_27, %c0_28] : memref<8x8x128xf32, #tpu.memory_space<vmem>>, vector<1x8x128xf32>
      %48 = vector.shape_cast %47 : vector<1x8x128xf32> to vector<8x128xf32>
      %c0_29 = arith.constant 0 : index
      %c0_30 = arith.constant 0 : index
      %49 = vector.load %arg7[%c0_29, %c0_30] : memref<8x256xf32, #tpu.memory_space<vmem>>, vector<8x128xf32>
      tpu.vector_store %arg7[%c0_29, %c0_30], %48 {strides = array<i32>} : memref<8x256xf32, #tpu.memory_space<vmem>>, vector<8x128xf32>,
      %c0_31 = arith.constant 0 : index
      %c0_32 = arith.constant 0 : index
      %50 = vector.load %arg7[%c0_31, %c0_32] : memref<8x256xf32, #tpu.memory_space<vmem>>, vector<8x256xf32>
      %c0_33 = arith.constant 0 : index
      %c0_34 = arith.constant 0 : index
      %51 = vector.load %arg3[%c0_33, %c0_34] : memref<256x256xf32, #tpu.memory_space<vmem>>, vector<256x256xf32>
      %cst = arith.constant dense<0.000000e+00> : vector<8x256xf32>
      %52 = tpu.matmul %50, %51, %cst {dimension_numbers = #tpu.dot_dimension_numbers<[1], [0], [0], [1], [0, 0, 1, 1], [], []>} : vector<8x256xf32>, vector<256x256xf32>, vector<8x256xf32> -> vector<8x256xf32>
      %53 = arith.addf %52, %5 : vector<8x256xf32>
      %54 = vector.extract_strided_slice %53 {offsets = [0, 0], sizes = [8, 128], strides = [1, 1]} : vector<8x256xf32> to vector<8x128xf32>
      %55 = vector.extract_strided_slice %53 {offsets = [0, 128], sizes = [8, 128], strides = [1, 1]} : vector<8x256xf32> to vector<8x128xf32>
      %cst_35 = arith.constant dense<0xFF800000> : vector<8xf32>
      %56 = vector.multi_reduction <maximumf>, %55, %cst_35 [1] : vector<8x128xf32> to vector<8xf32>
      %57 = vector.shape_cast %56 : vector<8xf32> to vector<8x1xf32>
      %58 = vector.broadcast %57 : vector<8x1xf32> to vector<8x128xf32>
      %59 = arith.subf %55, %58 : vector<8x128xf32>
      %60 = math.exp %59 : vector<8x128xf32>
      %cst_36 = arith.constant dense<0.000000e+00> : vector<8xf32>
      %61 = vector.multi_reduction <add>, %60, %cst_36 [1] : vector<8x128xf32> to vector<8xf32>
      %62 = vector.shape_cast %61 : vector<8xf32> to vector<8x1xf32>
      %63 = math.log %62 : vector<8x1xf32>
      %64 = vector.broadcast %63 : vector<8x1xf32> to vector<8x128xf32>
      %65 = arith.subf %59, %64 : vector<8x128xf32>
      %66 = arith.index_cast %c2_i32 : i32 to index
      %c0_37 = arith.constant 0 : index
      %c0_38 = arith.constant 0 : index
      %67 = vector.load %arg5[%66, %c0_37, %c0_38] : memref<8x8x128xf32, #tpu.memory_space<vmem>>, vector<1x8x128xf32>
      %68 = vector.shape_cast %67 : vector<1x8x128xf32> to vector<8x128xf32>
      %69 = vector.shape_cast %65 : vector<8x128xf32> to vector<1x8x128xf32>
      tpu.vector_store %arg5[%66, %c0_37, %c0_38], %69 {strides = array<i32>} : memref<8x8x128xf32, #tpu.memory_space<vmem>>, vector<1x8x128xf32>,
      %c0_39 = arith.constant 0 : index
      %c128 = arith.constant 128 : index
      %70 = vector.load %arg7[%c0_39, %c128] : memref<8x256xf32, #tpu.memory_space<vmem>>, vector<8x128xf32>
      tpu.vector_store %arg7[%c0_39, %c128], %54 {strides = array<i32>} : memref<8x256xf32, #tpu.memory_space<vmem>>, vector<8x128xf32>,
      %c7_i32_40 = arith.constant 7 : i32
      %71 = arith.cmpi eq, %17, %c7_i32_40 : i32
      %72 = arith.extui %71 : i1 to i32
      %c0_i32_41 = arith.constant 0 : i32
      %73 = arith.cmpi ne, %72, %c0_i32_41 : i32
      scf.if %73 {
        %c0_42 = arith.constant 0 : index
        %c0_43 = arith.constant 0 : index
        %74 = vector.load %arg6[%c0_42, %c0_43] : memref<8x128xf32, #tpu.memory_space<vmem>>, vector<8x128xf32>
        tpu.vector_store %arg6[%c0_42, %c0_43], %54 {strides = array<i32>} : memref<8x128xf32, #tpu.memory_space<vmem>>, vector<8x128xf32>,
      } else {
      }
    } else {
    }
    %c3_i32 = arith.constant 3 : i32
    %c8_i32_11 = arith.constant 8 : i32
    %21 = arith.muli %arg0, %c8_i32_11 : i32
    %22 = arith.addi %21, %c3_i32 : i32
    %c8_i32_12 = arith.constant 8 : i32
    %23 = arith.cmpi slt, %22, %c8_i32_12 : i32
    %24 = arith.extui %23 : i1 to i32
    %c0_i32_13 = arith.constant 0 : i32
    %25 = arith.cmpi ne, %24, %c0_i32_13 : i32
    scf.if %25 {
      %46 = arith.index_cast %c3_i32 : i32 to index
      %c0_27 = arith.constant 0 : index
      %c0_28 = arith.constant 0 : index
      %47 = vector.load %arg1[%46, %c0_27, %c0_28] : memref<8x8x128xf32, #tpu.memory_space<vmem>>, vector<1x8x128xf32>
      %48 = vector.shape_cast %47 : vector<1x8x128xf32> to vector<8x128xf32>
      %c0_29 = arith.constant 0 : index
      %c0_30 = arith.constant 0 : index
      %49 = vector.load %arg7[%c0_29, %c0_30] : memref<8x256xf32, #tpu.memory_space<vmem>>, vector<8x128xf32>
      tpu.vector_store %arg7[%c0_29, %c0_30], %48 {strides = array<i32>} : memref<8x256xf32, #tpu.memory_space<vmem>>, vector<8x128xf32>,
      %c0_31 = arith.constant 0 : index
      %c0_32 = arith.constant 0 : index
      %50 = vector.load %arg7[%c0_31, %c0_32] : memref<8x256xf32, #tpu.memory_space<vmem>>, vector<8x256xf32>
      %c0_33 = arith.constant 0 : index
      %c0_34 = arith.constant 0 : index
      %51 = vector.load %arg3[%c0_33, %c0_34] : memref<256x256xf32, #tpu.memory_space<vmem>>, vector<256x256xf32>
      %cst = arith.constant dense<0.000000e+00> : vector<8x256xf32>
      %52 = tpu.matmul %50, %51, %cst {dimension_numbers = #tpu.dot_dimension_numbers<[1], [0], [0], [1], [0, 0, 1, 1], [], []>} : vector<8x256xf32>, vector<256x256xf32>, vector<8x256xf32> -> vector<8x256xf32>
      %53 = arith.addf %52, %5 : vector<8x256xf32>
      %54 = vector.extract_strided_slice %53 {offsets = [0, 0], sizes = [8, 128], strides = [1, 1]} : vector<8x256xf32> to vector<8x128xf32>
      %55 = vector.extract_strided_slice %53 {offsets = [0, 128], sizes = [8, 128], strides = [1, 1]} : vector<8x256xf32> to vector<8x128xf32>
      %cst_35 = arith.constant dense<0xFF800000> : vector<8xf32>
      %56 = vector.multi_reduction <maximumf>, %55, %cst_35 [1] : vector<8x128xf32> to vector<8xf32>
      %57 = vector.shape_cast %56 : vector<8xf32> to vector<8x1xf32>
      %58 = vector.broadcast %57 : vector<8x1xf32> to vector<8x128xf32>
      %59 = arith.subf %55, %58 : vector<8x128xf32>
      %60 = math.exp %59 : vector<8x128xf32>
      %cst_36 = arith.constant dense<0.000000e+00> : vector<8xf32>
      %61 = vector.multi_reduction <add>, %60, %cst_36 [1] : vector<8x128xf32> to vector<8xf32>
      %62 = vector.shape_cast %61 : vector<8xf32> to vector<8x1xf32>
      %63 = math.log %62 : vector<8x1xf32>
      %64 = vector.broadcast %63 : vector<8x1xf32> to vector<8x128xf32>
      %65 = arith.subf %59, %64 : vector<8x128xf32>
      %66 = arith.index_cast %c3_i32 : i32 to index
      %c0_37 = arith.constant 0 : index
      %c0_38 = arith.constant 0 : index
      %67 = vector.load %arg5[%66, %c0_37, %c0_38] : memref<8x8x128xf32, #tpu.memory_space<vmem>>, vector<1x8x128xf32>
      %68 = vector.shape_cast %67 : vector<1x8x128xf32> to vector<8x128xf32>
      %69 = vector.shape_cast %65 : vector<8x128xf32> to vector<1x8x128xf32>
      tpu.vector_store %arg5[%66, %c0_37, %c0_38], %69 {strides = array<i32>} : memref<8x8x128xf32, #tpu.memory_space<vmem>>, vector<1x8x128xf32>,
      %c0_39 = arith.constant 0 : index
      %c128 = arith.constant 128 : index
      %70 = vector.load %arg7[%c0_39, %c128] : memref<8x256xf32, #tpu.memory_space<vmem>>, vector<8x128xf32>
      tpu.vector_store %arg7[%c0_39, %c128], %54 {strides = array<i32>} : memref<8x256xf32, #tpu.memory_space<vmem>>, vector<8x128xf32>,
      %c7_i32_40 = arith.constant 7 : i32
      %71 = arith.cmpi eq, %22, %c7_i32_40 : i32
      %72 = arith.extui %71 : i1 to i32
      %c0_i32_41 = arith.constant 0 : i32
      %73 = arith.cmpi ne, %72, %c0_i32_41 : i32
      scf.if %73 {
        %c0_42 = arith.constant 0 : index
        %c0_43 = arith.constant 0 : index
        %74 = vector.load %arg6[%c0_42, %c0_43] : memref<8x128xf32, #tpu.memory_space<vmem>>, vector<8x128xf32>
        tpu.vector_store %arg6[%c0_42, %c0_43], %54 {strides = array<i32>} : memref<8x128xf32, #tpu.memory_space<vmem>>, vector<8x128xf32>,
      } else {
      }
    } else {
    }
    %c4_i32 = arith.constant 4 : i32
    %c8_i32_14 = arith.constant 8 : i32
    %26 = arith.muli %arg0, %c8_i32_14 : i32
    %27 = arith.addi %26, %c4_i32 : i32
    %c8_i32_15 = arith.constant 8 : i32
    %28 = arith.cmpi slt, %27, %c8_i32_15 : i32
    %29 = arith.extui %28 : i1 to i32
    %c0_i32_16 = arith.constant 0 : i32
    %30 = arith.cmpi ne, %29, %c0_i32_16 : i32
    scf.if %30 {
      %46 = arith.index_cast %c4_i32 : i32 to index
      %c0_27 = arith.constant 0 : index
      %c0_28 = arith.constant 0 : index
      %47 = vector.load %arg1[%46, %c0_27, %c0_28] : memref<8x8x128xf32, #tpu.memory_space<vmem>>, vector<1x8x128xf32>
      %48 = vector.shape_cast %47 : vector<1x8x128xf32> to vector<8x128xf32>
      %c0_29 = arith.constant 0 : index
      %c0_30 = arith.constant 0 : index
      %49 = vector.load %arg7[%c0_29, %c0_30] : memref<8x256xf32, #tpu.memory_space<vmem>>, vector<8x128xf32>
      tpu.vector_store %arg7[%c0_29, %c0_30], %48 {strides = array<i32>} : memref<8x256xf32, #tpu.memory_space<vmem>>, vector<8x128xf32>,
      %c0_31 = arith.constant 0 : index
      %c0_32 = arith.constant 0 : index
      %50 = vector.load %arg7[%c0_31, %c0_32] : memref<8x256xf32, #tpu.memory_space<vmem>>, vector<8x256xf32>
      %c0_33 = arith.constant 0 : index
      %c0_34 = arith.constant 0 : index
      %51 = vector.load %arg3[%c0_33, %c0_34] : memref<256x256xf32, #tpu.memory_space<vmem>>, vector<256x256xf32>
      %cst = arith.constant dense<0.000000e+00> : vector<8x256xf32>
      %52 = tpu.matmul %50, %51, %cst {dimension_numbers = #tpu.dot_dimension_numbers<[1], [0], [0], [1], [0, 0, 1, 1], [], []>} : vector<8x256xf32>, vector<256x256xf32>, vector<8x256xf32> -> vector<8x256xf32>
      %53 = arith.addf %52, %5 : vector<8x256xf32>
      %54 = vector.extract_strided_slice %53 {offsets = [0, 0], sizes = [8, 128], strides = [1, 1]} : vector<8x256xf32> to vector<8x128xf32>
      %55 = vector.extract_strided_slice %53 {offsets = [0, 128], sizes = [8, 128], strides = [1, 1]} : vector<8x256xf32> to vector<8x128xf32>
      %cst_35 = arith.constant dense<0xFF800000> : vector<8xf32>
      %56 = vector.multi_reduction <maximumf>, %55, %cst_35 [1] : vector<8x128xf32> to vector<8xf32>
      %57 = vector.shape_cast %56 : vector<8xf32> to vector<8x1xf32>
      %58 = vector.broadcast %57 : vector<8x1xf32> to vector<8x128xf32>
      %59 = arith.subf %55, %58 : vector<8x128xf32>
      %60 = math.exp %59 : vector<8x128xf32>
      %cst_36 = arith.constant dense<0.000000e+00> : vector<8xf32>
      %61 = vector.multi_reduction <add>, %60, %cst_36 [1] : vector<8x128xf32> to vector<8xf32>
      %62 = vector.shape_cast %61 : vector<8xf32> to vector<8x1xf32>
      %63 = math.log %62 : vector<8x1xf32>
      %64 = vector.broadcast %63 : vector<8x1xf32> to vector<8x128xf32>
      %65 = arith.subf %59, %64 : vector<8x128xf32>
      %66 = arith.index_cast %c4_i32 : i32 to index
      %c0_37 = arith.constant 0 : index
      %c0_38 = arith.constant 0 : index
      %67 = vector.load %arg5[%66, %c0_37, %c0_38] : memref<8x8x128xf32, #tpu.memory_space<vmem>>, vector<1x8x128xf32>
      %68 = vector.shape_cast %67 : vector<1x8x128xf32> to vector<8x128xf32>
      %69 = vector.shape_cast %65 : vector<8x128xf32> to vector<1x8x128xf32>
      tpu.vector_store %arg5[%66, %c0_37, %c0_38], %69 {strides = array<i32>} : memref<8x8x128xf32, #tpu.memory_space<vmem>>, vector<1x8x128xf32>,
      %c0_39 = arith.constant 0 : index
      %c128 = arith.constant 128 : index
      %70 = vector.load %arg7[%c0_39, %c128] : memref<8x256xf32, #tpu.memory_space<vmem>>, vector<8x128xf32>
      tpu.vector_store %arg7[%c0_39, %c128], %54 {strides = array<i32>} : memref<8x256xf32, #tpu.memory_space<vmem>>, vector<8x128xf32>,
      %c7_i32_40 = arith.constant 7 : i32
      %71 = arith.cmpi eq, %27, %c7_i32_40 : i32
      %72 = arith.extui %71 : i1 to i32
      %c0_i32_41 = arith.constant 0 : i32
      %73 = arith.cmpi ne, %72, %c0_i32_41 : i32
      scf.if %73 {
        %c0_42 = arith.constant 0 : index
        %c0_43 = arith.constant 0 : index
        %74 = vector.load %arg6[%c0_42, %c0_43] : memref<8x128xf32, #tpu.memory_space<vmem>>, vector<8x128xf32>
        tpu.vector_store %arg6[%c0_42, %c0_43], %54 {strides = array<i32>} : memref<8x128xf32, #tpu.memory_space<vmem>>, vector<8x128xf32>,
      } else {
      }
    } else {
    }
    %c5_i32 = arith.constant 5 : i32
    %c8_i32_17 = arith.constant 8 : i32
    %31 = arith.muli %arg0, %c8_i32_17 : i32
    %32 = arith.addi %31, %c5_i32 : i32
    %c8_i32_18 = arith.constant 8 : i32
    %33 = arith.cmpi slt, %32, %c8_i32_18 : i32
    %34 = arith.extui %33 : i1 to i32
    %c0_i32_19 = arith.constant 0 : i32
    %35 = arith.cmpi ne, %34, %c0_i32_19 : i32
    scf.if %35 {
      %46 = arith.index_cast %c5_i32 : i32 to index
      %c0_27 = arith.constant 0 : index
      %c0_28 = arith.constant 0 : index
      %47 = vector.load %arg1[%46, %c0_27, %c0_28] : memref<8x8x128xf32, #tpu.memory_space<vmem>>, vector<1x8x128xf32>
      %48 = vector.shape_cast %47 : vector<1x8x128xf32> to vector<8x128xf32>
      %c0_29 = arith.constant 0 : index
      %c0_30 = arith.constant 0 : index
      %49 = vector.load %arg7[%c0_29, %c0_30] : memref<8x256xf32, #tpu.memory_space<vmem>>, vector<8x128xf32>
      tpu.vector_store %arg7[%c0_29, %c0_30], %48 {strides = array<i32>} : memref<8x256xf32, #tpu.memory_space<vmem>>, vector<8x128xf32>,
      %c0_31 = arith.constant 0 : index
      %c0_32 = arith.constant 0 : index
      %50 = vector.load %arg7[%c0_31, %c0_32] : memref<8x256xf32, #tpu.memory_space<vmem>>, vector<8x256xf32>
      %c0_33 = arith.constant 0 : index
      %c0_34 = arith.constant 0 : index
      %51 = vector.load %arg3[%c0_33, %c0_34] : memref<256x256xf32, #tpu.memory_space<vmem>>, vector<256x256xf32>
      %cst = arith.constant dense<0.000000e+00> : vector<8x256xf32>
      %52 = tpu.matmul %50, %51, %cst {dimension_numbers = #tpu.dot_dimension_numbers<[1], [0], [0], [1], [0, 0, 1, 1], [], []>} : vector<8x256xf32>, vector<256x256xf32>, vector<8x256xf32> -> vector<8x256xf32>
      %53 = arith.addf %52, %5 : vector<8x256xf32>
      %54 = vector.extract_strided_slice %53 {offsets = [0, 0], sizes = [8, 128], strides = [1, 1]} : vector<8x256xf32> to vector<8x128xf32>
      %55 = vector.extract_strided_slice %53 {offsets = [0, 128], sizes = [8, 128], strides = [1, 1]} : vector<8x256xf32> to vector<8x128xf32>
      %cst_35 = arith.constant dense<0xFF800000> : vector<8xf32>
      %56 = vector.multi_reduction <maximumf>, %55, %cst_35 [1] : vector<8x128xf32> to vector<8xf32>
      %57 = vector.shape_cast %56 : vector<8xf32> to vector<8x1xf32>
      %58 = vector.broadcast %57 : vector<8x1xf32> to vector<8x128xf32>
      %59 = arith.subf %55, %58 : vector<8x128xf32>
      %60 = math.exp %59 : vector<8x128xf32>
      %cst_36 = arith.constant dense<0.000000e+00> : vector<8xf32>
      %61 = vector.multi_reduction <add>, %60, %cst_36 [1] : vector<8x128xf32> to vector<8xf32>
      %62 = vector.shape_cast %61 : vector<8xf32> to vector<8x1xf32>
      %63 = math.log %62 : vector<8x1xf32>
      %64 = vector.broadcast %63 : vector<8x1xf32> to vector<8x128xf32>
      %65 = arith.subf %59, %64 : vector<8x128xf32>
      %66 = arith.index_cast %c5_i32 : i32 to index
      %c0_37 = arith.constant 0 : index
      %c0_38 = arith.constant 0 : index
      %67 = vector.load %arg5[%66, %c0_37, %c0_38] : memref<8x8x128xf32, #tpu.memory_space<vmem>>, vector<1x8x128xf32>
      %68 = vector.shape_cast %67 : vector<1x8x128xf32> to vector<8x128xf32>
      %69 = vector.shape_cast %65 : vector<8x128xf32> to vector<1x8x128xf32>
      tpu.vector_store %arg5[%66, %c0_37, %c0_38], %69 {strides = array<i32>} : memref<8x8x128xf32, #tpu.memory_space<vmem>>, vector<1x8x128xf32>,
      %c0_39 = arith.constant 0 : index
      %c128 = arith.constant 128 : index
      %70 = vector.load %arg7[%c0_39, %c128] : memref<8x256xf32, #tpu.memory_space<vmem>>, vector<8x128xf32>
      tpu.vector_store %arg7[%c0_39, %c128], %54 {strides = array<i32>} : memref<8x256xf32, #tpu.memory_space<vmem>>, vector<8x128xf32>,
      %c7_i32_40 = arith.constant 7 : i32
      %71 = arith.cmpi eq, %32, %c7_i32_40 : i32
      %72 = arith.extui %71 : i1 to i32
      %c0_i32_41 = arith.constant 0 : i32
      %73 = arith.cmpi ne, %72, %c0_i32_41 : i32
      scf.if %73 {
        %c0_42 = arith.constant 0 : index
        %c0_43 = arith.constant 0 : index
        %74 = vector.load %arg6[%c0_42, %c0_43] : memref<8x128xf32, #tpu.memory_space<vmem>>, vector<8x128xf32>
        tpu.vector_store %arg6[%c0_42, %c0_43], %54 {strides = array<i32>} : memref<8x128xf32, #tpu.memory_space<vmem>>, vector<8x128xf32>,
      } else {
      }
    } else {
    }
    %c6_i32 = arith.constant 6 : i32
    %c8_i32_20 = arith.constant 8 : i32
    %36 = arith.muli %arg0, %c8_i32_20 : i32
    %37 = arith.addi %36, %c6_i32 : i32
    %c8_i32_21 = arith.constant 8 : i32
    %38 = arith.cmpi slt, %37, %c8_i32_21 : i32
    %39 = arith.extui %38 : i1 to i32
    %c0_i32_22 = arith.constant 0 : i32
    %40 = arith.cmpi ne, %39, %c0_i32_22 : i32
    scf.if %40 {
      %46 = arith.index_cast %c6_i32 : i32 to index
      %c0_27 = arith.constant 0 : index
      %c0_28 = arith.constant 0 : index
      %47 = vector.load %arg1[%46, %c0_27, %c0_28] : memref<8x8x128xf32, #tpu.memory_space<vmem>>, vector<1x8x128xf32>
      %48 = vector.shape_cast %47 : vector<1x8x128xf32> to vector<8x128xf32>
      %c0_29 = arith.constant 0 : index
      %c0_30 = arith.constant 0 : index
      %49 = vector.load %arg7[%c0_29, %c0_30] : memref<8x256xf32, #tpu.memory_space<vmem>>, vector<8x128xf32>
      tpu.vector_store %arg7[%c0_29, %c0_30], %48 {strides = array<i32>} : memref<8x256xf32, #tpu.memory_space<vmem>>, vector<8x128xf32>,
      %c0_31 = arith.constant 0 : index
      %c0_32 = arith.constant 0 : index
      %50 = vector.load %arg7[%c0_31, %c0_32] : memref<8x256xf32, #tpu.memory_space<vmem>>, vector<8x256xf32>
      %c0_33 = arith.constant 0 : index
      %c0_34 = arith.constant 0 : index
      %51 = vector.load %arg3[%c0_33, %c0_34] : memref<256x256xf32, #tpu.memory_space<vmem>>, vector<256x256xf32>
      %cst = arith.constant dense<0.000000e+00> : vector<8x256xf32>
      %52 = tpu.matmul %50, %51, %cst {dimension_numbers = #tpu.dot_dimension_numbers<[1], [0], [0], [1], [0, 0, 1, 1], [], []>} : vector<8x256xf32>, vector<256x256xf32>, vector<8x256xf32> -> vector<8x256xf32>
      %53 = arith.addf %52, %5 : vector<8x256xf32>
      %54 = vector.extract_strided_slice %53 {offsets = [0, 0], sizes = [8, 128], strides = [1, 1]} : vector<8x256xf32> to vector<8x128xf32>
      %55 = vector.extract_strided_slice %53 {offsets = [0, 128], sizes = [8, 128], strides = [1, 1]} : vector<8x256xf32> to vector<8x128xf32>
      %cst_35 = arith.constant dense<0xFF800000> : vector<8xf32>
      %56 = vector.multi_reduction <maximumf>, %55, %cst_35 [1] : vector<8x128xf32> to vector<8xf32>
      %57 = vector.shape_cast %56 : vector<8xf32> to vector<8x1xf32>
      %58 = vector.broadcast %57 : vector<8x1xf32> to vector<8x128xf32>
      %59 = arith.subf %55, %58 : vector<8x128xf32>
      %60 = math.exp %59 : vector<8x128xf32>
      %cst_36 = arith.constant dense<0.000000e+00> : vector<8xf32>
      %61 = vector.multi_reduction <add>, %60, %cst_36 [1] : vector<8x128xf32> to vector<8xf32>
      %62 = vector.shape_cast %61 : vector<8xf32> to vector<8x1xf32>
      %63 = math.log %62 : vector<8x1xf32>
      %64 = vector.broadcast %63 : vector<8x1xf32> to vector<8x128xf32>
      %65 = arith.subf %59, %64 : vector<8x128xf32>
      %66 = arith.index_cast %c6_i32 : i32 to index
      %c0_37 = arith.constant 0 : index
      %c0_38 = arith.constant 0 : index
      %67 = vector.load %arg5[%66, %c0_37, %c0_38] : memref<8x8x128xf32, #tpu.memory_space<vmem>>, vector<1x8x128xf32>
      %68 = vector.shape_cast %67 : vector<1x8x128xf32> to vector<8x128xf32>
      %69 = vector.shape_cast %65 : vector<8x128xf32> to vector<1x8x128xf32>
      tpu.vector_store %arg5[%66, %c0_37, %c0_38], %69 {strides = array<i32>} : memref<8x8x128xf32, #tpu.memory_space<vmem>>, vector<1x8x128xf32>,
      %c0_39 = arith.constant 0 : index
      %c128 = arith.constant 128 : index
      %70 = vector.load %arg7[%c0_39, %c128] : memref<8x256xf32, #tpu.memory_space<vmem>>, vector<8x128xf32>
      tpu.vector_store %arg7[%c0_39, %c128], %54 {strides = array<i32>} : memref<8x256xf32, #tpu.memory_space<vmem>>, vector<8x128xf32>,
      %c7_i32_40 = arith.constant 7 : i32
      %71 = arith.cmpi eq, %37, %c7_i32_40 : i32
      %72 = arith.extui %71 : i1 to i32
      %c0_i32_41 = arith.constant 0 : i32
      %73 = arith.cmpi ne, %72, %c0_i32_41 : i32
      scf.if %73 {
        %c0_42 = arith.constant 0 : index
        %c0_43 = arith.constant 0 : index
        %74 = vector.load %arg6[%c0_42, %c0_43] : memref<8x128xf32, #tpu.memory_space<vmem>>, vector<8x128xf32>
        tpu.vector_store %arg6[%c0_42, %c0_43], %54 {strides = array<i32>} : memref<8x128xf32, #tpu.memory_space<vmem>>, vector<8x128xf32>,
      } else {
      }
    } else {
    }
    %c7_i32 = arith.constant 7 : i32
    %c8_i32_23 = arith.constant 8 : i32
    %41 = arith.muli %arg0, %c8_i32_23 : i32
    %42 = arith.addi %41, %c7_i32 : i32
    %c8_i32_24 = arith.constant 8 : i32
    %43 = arith.cmpi slt, %42, %c8_i32_24 : i32
    %44 = arith.extui %43 : i1 to i32
    %c0_i32_25 = arith.constant 0 : i32
    %45 = arith.cmpi ne, %44, %c0_i32_25 : i32
    scf.if %45 {
      %46 = arith.index_cast %c7_i32 : i32 to index
      %c0_27 = arith.constant 0 : index
      %c0_28 = arith.constant 0 : index
      %47 = vector.load %arg1[%46, %c0_27, %c0_28] : memref<8x8x128xf32, #tpu.memory_space<vmem>>, vector<1x8x128xf32>
      %48 = vector.shape_cast %47 : vector<1x8x128xf32> to vector<8x128xf32>
      %c0_29 = arith.constant 0 : index
      %c0_30 = arith.constant 0 : index
      %49 = vector.load %arg7[%c0_29, %c0_30] : memref<8x256xf32, #tpu.memory_space<vmem>>, vector<8x128xf32>
      tpu.vector_store %arg7[%c0_29, %c0_30], %48 {strides = array<i32>} : memref<8x256xf32, #tpu.memory_space<vmem>>, vector<8x128xf32>,
      %c0_31 = arith.constant 0 : index
      %c0_32 = arith.constant 0 : index
      %50 = vector.load %arg7[%c0_31, %c0_32] : memref<8x256xf32, #tpu.memory_space<vmem>>, vector<8x256xf32>
      %c0_33 = arith.constant 0 : index
      %c0_34 = arith.constant 0 : index
      %51 = vector.load %arg3[%c0_33, %c0_34] : memref<256x256xf32, #tpu.memory_space<vmem>>, vector<256x256xf32>
      %cst = arith.constant dense<0.000000e+00> : vector<8x256xf32>
      %52 = tpu.matmul %50, %51, %cst {dimension_numbers = #tpu.dot_dimension_numbers<[1], [0], [0], [1], [0, 0, 1, 1], [], []>} : vector<8x256xf32>, vector<256x256xf32>, vector<8x256xf32> -> vector<8x256xf32>
      %53 = arith.addf %52, %5 : vector<8x256xf32>
      %54 = vector.extract_strided_slice %53 {offsets = [0, 0], sizes = [8, 128], strides = [1, 1]} : vector<8x256xf32> to vector<8x128xf32>
      %55 = vector.extract_strided_slice %53 {offsets = [0, 128], sizes = [8, 128], strides = [1, 1]} : vector<8x256xf32> to vector<8x128xf32>
      %cst_35 = arith.constant dense<0xFF800000> : vector<8xf32>
      %56 = vector.multi_reduction <maximumf>, %55, %cst_35 [1] : vector<8x128xf32> to vector<8xf32>
      %57 = vector.shape_cast %56 : vector<8xf32> to vector<8x1xf32>
      %58 = vector.broadcast %57 : vector<8x1xf32> to vector<8x128xf32>
      %59 = arith.subf %55, %58 : vector<8x128xf32>
      %60 = math.exp %59 : vector<8x128xf32>
      %cst_36 = arith.constant dense<0.000000e+00> : vector<8xf32>
      %61 = vector.multi_reduction <add>, %60, %cst_36 [1] : vector<8x128xf32> to vector<8xf32>
      %62 = vector.shape_cast %61 : vector<8xf32> to vector<8x1xf32>
      %63 = math.log %62 : vector<8x1xf32>
      %64 = vector.broadcast %63 : vector<8x1xf32> to vector<8x128xf32>
      %65 = arith.subf %59, %64 : vector<8x128xf32>
      %66 = arith.index_cast %c7_i32 : i32 to index
      %c0_37 = arith.constant 0 : index
      %c0_38 = arith.constant 0 : index
      %67 = vector.load %arg5[%66, %c0_37, %c0_38] : memref<8x8x128xf32, #tpu.memory_space<vmem>>, vector<1x8x128xf32>
      %68 = vector.shape_cast %67 : vector<1x8x128xf32> to vector<8x128xf32>
      %69 = vector.shape_cast %65 : vector<8x128xf32> to vector<1x8x128xf32>
      tpu.vector_store %arg5[%66, %c0_37, %c0_38], %69 {strides = array<i32>} : memref<8x8x128xf32, #tpu.memory_space<vmem>>, vector<1x8x128xf32>,
      %c0_39 = arith.constant 0 : index
      %c128 = arith.constant 128 : index
      %70 = vector.load %arg7[%c0_39, %c128] : memref<8x256xf32, #tpu.memory_space<vmem>>, vector<8x128xf32>
      tpu.vector_store %arg7[%c0_39, %c128], %54 {strides = array<i32>} : memref<8x256xf32, #tpu.memory_space<vmem>>, vector<8x128xf32>,
      %c7_i32_40 = arith.constant 7 : i32
      %71 = arith.cmpi eq, %42, %c7_i32_40 : i32
      %72 = arith.extui %71 : i1 to i32
      %c0_i32_41 = arith.constant 0 : i32
      %73 = arith.cmpi ne, %72, %c0_i32_41 : i32
      scf.if %73 {
        %c0_42 = arith.constant 0 : index
        %c0_43 = arith.constant 0 : index
        %74 = vector.load %arg6[%c0_42, %c0_43] : memref<8x128xf32, #tpu.memory_space<vmem>>, vector<8x128xf32>
        tpu.vector_store %arg6[%c0_42, %c0_43], %54 {strides = array<i32>} : memref<8x128xf32, #tpu.memory_space<vmem>>, vector<8x128xf32>,
      } else {
      }
    } else {
    }
    %c8_i32_26 = arith.constant 8 : i32
    return
  }
  func.func @transform_0(%arg0: i32) -> (i32, i32, i32) {
    %c0_i32 = arith.constant 0 : i32
    %c0_i32_0 = arith.constant 0 : i32
    %c0_i32_1 = arith.constant 0 : i32
    return %arg0, %c0_i32, %c0_i32_0 : i32, i32, i32
  }
  func.func @transform_1(%arg0: i32) -> (i32, i32) {
    %c0_i32 = arith.constant 0 : i32
    %c0_i32_0 = arith.constant 0 : i32
    %c0_i32_1 = arith.constant 0 : i32
    return %c0_i32, %c0_i32_0 : i32, i32
  }
  func.func @transform_2(%arg0: i32) -> (i32, i32) {
    %c0_i32 = arith.constant 0 : i32
    %c0_i32_0 = arith.constant 0 : i32
    %c0_i32_1 = arith.constant 0 : i32
    return %c0_i32, %c0_i32_0 : i32, i32
  }
  func.func @transform_3(%arg0: i32) -> (i32, i32) {
    %c0_i32 = arith.constant 0 : i32
    %c0_i32_0 = arith.constant 0 : i32
    %c0_i32_1 = arith.constant 0 : i32
    return %c0_i32, %c0_i32_0 : i32, i32
  }
  func.func @transform_4(%arg0: i32) -> (i32, i32, i32) {
    %c0_i32 = arith.constant 0 : i32
    %c0_i32_0 = arith.constant 0 : i32
    %c0_i32_1 = arith.constant 0 : i32
    return %arg0, %c0_i32, %c0_i32_0 : i32, i32, i32
  }
  func.func @transform_5(%arg0: i32) -> (i32, i32) {
    %c0_i32 = arith.constant 0 : i32
    %c0_i32_0 = arith.constant 0 : i32
    %c0_i32_1 = arith.constant 0 : i32
    return %c0_i32, %c0_i32_0 : i32, i32
  }
}

</mosaic_0001>

<bundles_post_ra>
// kernel: tpu_custom_call.1
= control target key start
LH: loop header
LB: loop body
LE: loop exit
PB: predicated region body
PF: predicated region fallthrough
CT: control target
= control target key end

     0   :  { %11 = vsyncpa [#allocation4], 0  ;;  %s2432_s0 = inlined_call_operand.hbm [shape: f32[8,8,128], index: 0, kind: input, shape index: {}]   ;;  %s2433_s1 = inlined_call_operand.hbm [shape: f32[8,128], index: 1, kind: input, shape index: {}]   ;;  %s2434_s2 = inlined_call_operand.hbm [shape: f32[256,256], index: 2, kind: input, shape index: {}]   ;;  %s2435_s3 = inlined_call_operand.vmem [shape: f32[1,256], index: 3, kind: input, shape index: {}]   ;;  %s2436_s4 = inlined_call_operand.hbm [shape: f32[8,8,128], index: 4, kind: output, shape index: {0}]   ;;  %s2437_s5 = inlined_call_operand.hbm [shape: f32[8,128], index: 5, kind: output, shape index: {1}]  }
   0x1   :  { %12 = vsyncpa [#allocation7], 0 }
   0x2   :  { %13 = vsyncpa [#allocation5], 0 }
   0x3   :  { %14 = vsyncpa [#allocation11], 0  ;;  %s1561_s18 = smov [#allocation6]   ;;  %s1562_s20 = smov [#allocation3]  }
   0x4   :  { %s33_s19 = sshll.u32 %s1561_s18, 4  ;;  %s20_s21 = sshll.u32 %s1562_s20, 4  ;;  %s34_s19 = int_to_ptr.vmem [resolvable:$true] %s33_s19  ;;  %s21_s21 = int_to_ptr.vmem [resolvable:$true] %s20_s21 }
   0x5   :  { %s1461_s22 = scalar_lea.vmem %s34_s19, 128  ;;  %p1466_p1 = scmp.lt.s32.totalorder %s34_s19, %s34_s19 }
   0x6   :  { %p1462_p0 = scmp.ne.s32.totalorder %s34_s19, %s1461_s22  ;;  %p1467_p2 = scmp.lt.s32.totalorder %s1461_s22, %s1461_s22 }
   0x8   :  { %p1468_p3 = por %p1467_p2, %p1466_p1 }
   0xa   :  { %p1469_p4 = pnand %p1468_p3, %p1462_p0 }
   0xc   :  { %1472 = shalt.err (!%p1469_p4)
}
   0xd   :  { %36 = dma.hbm_to_vmem [thread:$0]  %s2433_s1, 128, %s34_s19, [#allocation7]  }
   0xe   :  { %s1481_s25 = scalar_lea.vmem %s21_s21, 1024  ;;  %p1486_p6 = scmp.lt.s32.totalorder %s21_s21, %s21_s21 }
   0xf   :  { %p1482_p5 = scmp.ne.s32.totalorder %s21_s21, %s1481_s25  ;;  %p1487_p7 = scmp.lt.s32.totalorder %s1481_s25, %s1481_s25 }
  0x11   :  { %p1488_p8 = por %p1487_p7, %p1486_p6 }
  0x13   :  { %p1489_p9 = pnand %p1488_p8, %p1482_p5 }
  0x15   :  { %1492 = shalt.err (!%p1489_p9)
}
  0x16   :  { %s1563_s26 = smov 128   ;;  %s1564_s27 = smov 8  }
  0x17   :  { %26 = dma.hbm_to_vmem [thread:$0]  %s2432_s0, 1024, %s21_s21, [#allocation4], %s1563_s26, %s1563_s26, %s1564_s27  }
  0x18   :  { %s1565_s30 = smov [#allocation8]  }
  0x19   :  { %s42_s6 = sshll.u32 %s1565_s30, 4  ;;  %s43_s6 = int_to_ptr.vmem [resolvable:$true] %s42_s6 }
  0x1a   :  { %s1501_s1 = scalar_lea.vmem %s43_s6, 8192  ;;  %p1506_p11 = scmp.lt.s32.totalorder %s43_s6, %s43_s6 }
  0x1b   :  { %p1502_p10 = scmp.ne.s32.totalorder %s43_s6, %s1501_s1  ;;  %p1507_p12 = scmp.lt.s32.totalorder %s1501_s1, %s1501_s1 }
  0x1d   :  { %p1508_p13 = por %p1507_p12, %p1506_p11 }
  0x1f   :  { %p1509_p0 = pnand %p1508_p13, %p1502_p10 }
  0x21   :  { %1512 = shalt.err (!%p1509_p0)
}
  0x22   :  { %s1566_s7 = smov 256   ;;  %s1567_s8 = smov 16  }
  0x23   :  { %48 = dma.hbm_to_vmem [thread:$0]  %s2434_s2, 8192, %s43_s6, [#allocation7], %s1566_s7, %s1566_s7, %s1567_s8  }
  0x24   :  { %1553 = dma.done.wait [#allocation4], 1024  }
  0x25   :  { %1554 = vsyncadd [#allocation4], 4294966272 }
  0x26   :  { %1555 = dma.done.wait [#allocation7], 8320  }
  0x27   :  { %1556 = vsyncadd [#allocation7], 4294958976  ;;  %v1612_v0 = vld [vmem:[#allocation8 + $0xf8] sm:$0xff]  ;;  %v1614_v1 = vld [vmem:[#allocation8 + $0xf0] sm:$0xff] }
  0x28   :  { %v1616_v2 = vld [vmem:[#allocation8 + $0xe8] sm:$0xff]  ;;  %151 = vmatprep.subr.mxu0 %v1612_v0  ;;  %v1619_v3 = vld [vmem:[#allocation8 + $0xe0] sm:$0xff]  ;;  %313 = vmatprep.subr.mxu1 %v1612_v0  ;;  %v1623_v4 = vld [vmem:[#allocation8 + $0xd8] sm:$0xff] }
  0x29   :  { %152 = vmatpush1.msra.mxu0 %v1614_v1  ;;  %314 = vmatpush1.msra.mxu1 %v1614_v1  ;;  %v1627_v5 = vld [vmem:[#allocation8 + $0xd0] sm:$0xff]  ;;  %v1631_v6 = vld [vmem:[#allocation8 + $0xc8] sm:$0xff]  ;;  %v1635_v7 = vld [vmem:[#allocation8 + $0xc0] sm:$0xff] }
  0x2a   :  { %153 = vmatprep.subr.mxu0 %v1616_v2  ;;  %315 = vmatprep.subr.mxu1 %v1616_v2  ;;  %v1639_v8 = vld [vmem:[#allocation8 + $0xb8] sm:$0xff]  ;;  %v1643_v9 = vld [vmem:[#allocation8 + $0xb0] sm:$0xff]  ;;  %v1647_v10 = vld [vmem:[#allocation8 + $0xa8] sm:$0xff] }
  0x2b   :  { %154 = vmatpush1.msra.mxu0 %v1619_v3  ;;  %316 = vmatpush1.msra.mxu1 %v1619_v3  ;;  %v1651_v11 = vld [vmem:[#allocation8 + $0xa0] sm:$0xff]  ;;  %v1655_v12 = vld [vmem:[#allocation8 + $0x98] sm:$0xff]  ;;  %v1659_v13 = vld [vmem:[#allocation8 + $0x90] sm:$0xff] }
  0x2c   :  { %155 = vmatprep.subr.mxu0 %v1623_v4  ;;  %317 = vmatprep.subr.mxu1 %v1623_v4  ;;  %v1663_v14 = vld [vmem:[#allocation8 + $0x88] sm:$0xff]  ;;  %v1667_v15 = vld [vmem:[#allocation8 + $0x80] sm:$0xff]  ;;  %v1671_v16 = vld [vmem:[#allocation8 + $0x78] sm:$0xff] }
  0x2d   :  { %156 = vmatpush1.msra.mxu0 %v1627_v5  ;;  %318 = vmatpush1.msra.mxu1 %v1627_v5  ;;  %v1675_v17 = vld [vmem:[#allocation8 + $0x70] sm:$0xff]  ;;  %v1679_v18 = vld [vmem:[#allocation8 + $0x68] sm:$0xff]  ;;  %v1683_v19 = vld [vmem:[#allocation8 + $0x60] sm:$0xff] }
  0x2e   :  { %157 = vmatprep.subr.mxu0 %v1631_v6  ;;  %319 = vmatprep.subr.mxu1 %v1631_v6  ;;  %v1687_v20 = vld [vmem:[#allocation8 + $0x58] sm:$0xff]  ;;  %v1691_v21 = vld [vmem:[#allocation8 + $0x50] sm:$0xff]  ;;  %v1695_v22 = vld [vmem:[#allocation8 + $0x48] sm:$0xff] }
  0x2f   :  { %158 = vmatpush1.msra.mxu0 %v1635_v7  ;;  %320 = vmatpush1.msra.mxu1 %v1635_v7  ;;  %v1699_v23 = vld [vmem:[#allocation8 + $0x40] sm:$0xff]  ;;  %v64_v24 = vld [vmem:[#allocation6] sm:$0xff]  ;;  %v1706_v26 = vld [vmem:[#allocation8 + $0x30] sm:$0xff] }
  0x30   :  { %159 = vmatprep.subr.mxu0 %v1639_v8  ;;  %321 = vmatprep.subr.mxu1 %v1639_v8  ;;  %v1703_v25 = vld [vmem:[#allocation8 + $0x38] sm:$0xff]  ;;  %v1710_v27 = vld [vmem:[#allocation8 + $0x28] sm:$0xff]  ;;  %v1714_v28 = vld [vmem:[#allocation8 + $0x20] sm:$0xff] }
  0x31   :  { %160 = vmatpush1.msra.mxu0 %v1643_v9  ;;  %322 = vmatpush1.msra.mxu1 %v1643_v9  ;;  %v1718_v29 = vld [vmem:[#allocation8 + $0x18] sm:$0xff]  ;;  %v1722_v30 = vld [vmem:[#allocation8 + $0x10] sm:$0xff]  ;;  %v1726_v31 = vld [vmem:[#allocation8 + $0x8] sm:$0xff] }
  0x32   :  { %161 = vmatprep.subr.mxu0 %v1647_v10  ;;  %323 = vmatprep.subr.mxu1 %v1647_v10  ;;  %v1730_v32 = vld [vmem:[#allocation8] sm:$0xff]  ;;  %v1734_v33 = vld [vmem:[#allocation8 + $0x1f8] sm:$0xff]  ;;  %v1738_v34 = vld [vmem:[#allocation8 + $0x1f0] sm:$0xff] }
  0x33   :  { %162 = vmatpush1.msra.mxu0 %v1651_v11  ;;  %324 = vmatpush1.msra.mxu1 %v1651_v11  ;;  %v1742_v35 = vld [vmem:[#allocation8 + $0x1e8] sm:$0xff]  ;;  %v1746_v36 = vld [vmem:[#allocation8 + $0x1e0] sm:$0xff]  ;;  %v1750_v37 = vld [vmem:[#allocation8 + $0x1d8] sm:$0xff] }
  0x34   :  { %163 = vmatprep.subr.mxu0 %v1655_v12  ;;  %325 = vmatprep.subr.mxu1 %v1655_v12  ;;  %v1754_v38 = vld [vmem:[#allocation8 + $0x1d0] sm:$0xff]  ;;  %v1758_v39 = vld [vmem:[#allocation8 + $0x1c8] sm:$0xff]  ;;  %v1762_v40 = vld [vmem:[#allocation8 + $0x1c0] sm:$0xff] }
  0x35   :  { %164 = vmatpush1.msra.mxu0 %v1659_v13  ;;  %326 = vmatpush1.msra.mxu1 %v1659_v13  ;;  %v1766_v41 = vld [vmem:[#allocation8 + $0x1b8] sm:$0xff]  ;;  %v1770_v42 = vld [vmem:[#allocation8 + $0x1b0] sm:$0xff]  ;;  %v1774_v43 = vld [vmem:[#allocation8 + $0x1a8] sm:$0xff] }
  0x36   :  { %165 = vmatprep.subr.mxu0 %v1663_v14  ;;  %327 = vmatprep.subr.mxu1 %v1663_v14  ;;  %v1778_v44 = vld [vmem:[#allocation8 + $0x1a0] sm:$0xff]  ;;  %v1782_v45 = vld [vmem:[#allocation8 + $0x198] sm:$0xff]  ;;  %v1786_v46 = vld [vmem:[#allocation8 + $0x190] sm:$0xff] }
  0x37   :  { %166 = vmatpush1.msra.mxu0 %v1667_v15  ;;  %328 = vmatpush1.msra.mxu1 %v1667_v15  ;;  %v1790_v47 = vld [vmem:[#allocation8 + $0x188] sm:$0xff]  ;;  %v1794_v48 = vld [vmem:[#allocation8 + $0x180] sm:$0xff]  ;;  %v1798_v49 = vld [vmem:[#allocation8 + $0x178] sm:$0xff] }
  0x38   :  { %167 = vmatprep.subr.mxu0 %v1671_v16  ;;  %329 = vmatprep.subr.mxu1 %v1671_v16  ;;  %v1802_v50 = vld [vmem:[#allocation8 + $0x170] sm:$0xff]  ;;  %v1806_v51 = vld [vmem:[#allocation8 + $0x168] sm:$0xff]  ;;  %v1810_v52 = vld [vmem:[#allocation8 + $0x160] sm:$0xff] }
  0x39   :  { %168 = vmatpush1.msra.mxu0 %v1675_v17  ;;  %330 = vmatpush1.msra.mxu1 %v1675_v17  ;;  %v1814_v53 = vld [vmem:[#allocation8 + $0x158] sm:$0xff]  ;;  %v1818_v54 = vld [vmem:[#allocation8 + $0x150] sm:$0xff]  ;;  %v1822_v55 = vld [vmem:[#allocation8 + $0x148] sm:$0xff] }
  0x3a   :  { %169 = vmatprep.subr.mxu0 %v1679_v18  ;;  %331 = vmatprep.subr.mxu1 %v1679_v18  ;;  %2472 = vst [vmem:[#allocation16_spill] sm:$0xff] %v1814_v53  ;;  %2473 = vst [vmem:[#allocation17_spill] sm:$0xff] %v1818_v54  ;;  %v1826_v56 = vld [vmem:[#allocation8 + $0x140] sm:$0xff]  ;;  %v1830_v57 = vld [vmem:[#allocation8 + $0x138] sm:$0xff] }
  0x3b   :  { %170 = vmatpush1.msra.mxu0 %v1683_v19  ;;  %332 = vmatpush1.msra.mxu1 %v1683_v19  ;;  %2474 = vst [vmem:[#allocation18_spill] sm:$0xff] %v1822_v55  ;;  %2475 = vst [vmem:[#allocation19_spill] sm:$0xff] %v1826_v56  ;;  %v1834_v58 = vld [vmem:[#allocation8 + $0x130] sm:$0xff]  ;;  %v1838_v59 = vld [vmem:[#allocation8 + $0x128] sm:$0xff] }
  0x3c   :  { %171 = vmatprep.subr.mxu0 %v1687_v20  ;;  %333 = vmatprep.subr.mxu1 %v1687_v20  ;;  %2476 = vst [vmem:[#allocation20_spill] sm:$0xff] %v1830_v57  ;;  %2477 = vst [vmem:[#allocation21_spill] sm:$0xff] %v1834_v58  ;;  %v1842_v60 = vld [vmem:[#allocation8 + $0x120] sm:$0xff]  ;;  %v1846_v61 = vld [vmem:[#allocation8 + $0x118] sm:$0xff] }
  0x3d   :  { %172 = vmatpush1.msra.mxu0 %v1691_v21  ;;  %215 = vmatprep.mubr.f32.mxu0 %v64_v24  ;;  %2478 = vst [vmem:[#allocation22_spill] sm:$0xff] %v1838_v59  ;;  %2479 = vst [vmem:[#allocation23_spill] sm:$0xff] %v1842_v60  ;;  %v1850_v62 = vld [vmem:[#allocation8 + $0x110] sm:$0xff]  ;;  %v1854_v63 = vld [vmem:[#allocation8 + $0x108] sm:$0xff] }
  0x3e   :  { %173 = vmatprep.subr.mxu0 %v1695_v22  ;;  %334 = vmatpush1.msra.mxu1 %v1691_v21  ;;  %2480 = vst [vmem:[#allocation24_spill] sm:$0xff] %v1846_v61  ;;  %2481 = vst [vmem:[#allocation25_spill] sm:$0xff] %v1850_v62  ;;  %v1858_v24 = vld [vmem:[#allocation8 + $0x100] sm:$0xff] }
  0x3f   :  { %174 = vmatpush1.msra.mxu0 %v1699_v23  ;;  %335 = vmatprep.subr.mxu1 %v1695_v22  ;;  %2482 = vst [vmem:[#allocation26_spill] sm:$0xff] %v1854_v63 }
  0x40   :  { %175 = vmatprep.subr.mxu0 %v1703_v25  ;;  %336 = vmatpush1.msra.mxu1 %v1699_v23 }
  0x41   :  { %176 = vmatpush1.msra.mxu0 %v1706_v26  ;;  %337 = vmatprep.subr.mxu1 %v1703_v25 }
  0x42   :  { %177 = vmatprep.subr.mxu0 %v1710_v27  ;;  %338 = vmatpush1.msra.mxu1 %v1706_v26 }
  0x43   :  { %178 = vmatpush1.msra.mxu0 %v1714_v28  ;;  %339 = vmatprep.subr.mxu1 %v1710_v27 }
  0x44   :  { %179 = vmatprep.subr.mxu0 %v1718_v29  ;;  %340 = vmatpush1.msra.mxu1 %v1714_v28 }
  0x45   :  { %180 = vmatpush1.msra.mxu0 %v1722_v30  ;;  %341 = vmatprep.subr.mxu1 %v1718_v29 }
  0x46   :  { %181 = vmatprep.subr.mxu0 %v1726_v31  ;;  %342 = vmatpush1.msra.mxu1 %v1722_v30 }
  0x47   :  { %182 = vmatpush1.msra.mxu0 %v1730_v32  ;;  %343 = vmatprep.subr.mxu1 %v1726_v31 }
  0x48   :  { %183 = vmatprep.subr.mxu0 %v1734_v33  ;;  %344 = vmatpush1.msra.mxu1 %v1730_v32 }
  0x49   :  { %184 = vmatpush2.msra.mxu0 %v1738_v34  ;;  %345 = vmatprep.subr.mxu1 %v1734_v33 }
  0x4a   :  { %185 = vmatprep.subr.mxu0 %v1742_v35  ;;  %346 = vmatpush2.msra.mxu1 %v1738_v34 }
  0x4b   :  { %186 = vmatpush2.msra.mxu0 %v1746_v36  ;;  %347 = vmatprep.subr.mxu1 %v1742_v35 }
  0x4c   :  { %187 = vmatprep.subr.mxu0 %v1750_v37  ;;  %348 = vmatpush2.msra.mxu1 %v1746_v36 }
  0x4d   :  { %188 = vmatpush2.msra.mxu0 %v1754_v38  ;;  %349 = vmatprep.subr.mxu1 %v1750_v37 }
  0x4e   :  { %189 = vmatprep.subr.mxu0 %v1758_v39  ;;  %350 = vmatpush2.msra.mxu1 %v1754_v38 }
  0x4f   :  { %190 = vmatpush2.msra.mxu0 %v1762_v40  ;;  %351 = vmatprep.subr.mxu1 %v1758_v39 }
  0x50   :  { %191 = vmatprep.subr.mxu0 %v1766_v41  ;;  %352 = vmatpush2.msra.mxu1 %v1762_v40 }
  0x51   :  { %192 = vmatpush2.msra.mxu0 %v1770_v42  ;;  %353 = vmatprep.subr.mxu1 %v1766_v41 }
  0x52   :  { %193 = vmatprep.subr.mxu0 %v1774_v43  ;;  %354 = vmatpush2.msra.mxu1 %v1770_v42 }
  0x53   :  { %194 = vmatpush2.msra.mxu0 %v1778_v44  ;;  %355 = vmatprep.subr.mxu1 %v1774_v43 }
  0x54   :  { %195 = vmatprep.subr.mxu0 %v1782_v45  ;;  %356 = vmatpush2.msra.mxu1 %v1778_v44 }
  0x55   :  { %196 = vmatpush2.msra.mxu0 %v1786_v46  ;;  %357 = vmatprep.subr.mxu1 %v1782_v45 }
  0x56   :  { %197 = vmatprep.subr.mxu0 %v1790_v47  ;;  %358 = vmatpush2.msra.mxu1 %v1786_v46 }
  0x57   :  { %198 = vmatpush2.msra.mxu0 %v1794_v48  ;;  %359 = vmatprep.subr.mxu1 %v1790_v47 }
  0x58   :  { %199 = vmatprep.subr.mxu0 %v1798_v49  ;;  %360 = vmatpush2.msra.mxu1 %v1794_v48 }
  0x59   :  { %200 = vmatpush2.msra.mxu0 %v1802_v50  ;;  %361 = vmatprep.subr.mxu1 %v1798_v49 }
  0x5a   :  { %201 = vmatprep.subr.mxu0 %v1806_v51  ;;  %362 = vmatpush2.msra.mxu1 %v1802_v50 }
  0x5b   :  { %202 = vmatpush2.msra.mxu0 %v1810_v52  ;;  %363 = vmatprep.subr.mxu1 %v1806_v51 }
  0x5c   :  { %203 = vmatprep.subr.mxu0 %v1814_v53  ;;  %364 = vmatpush2.msra.mxu1 %v1810_v52 }
  0x5d   :  { %204 = vmatpush2.msra.mxu0 %v1818_v54  ;;  %365 = vmatprep.subr.mxu1 %v1814_v53 }
  0x5e   :  { %205 = vmatprep.subr.mxu0 %v1822_v55  ;;  %366 = vmatpush2.msra.mxu1 %v1818_v54 }
  0x5f   :  { %206 = vmatpush2.msra.mxu0 %v1826_v56  ;;  %367 = vmatprep.subr.mxu1 %v1822_v55 }
  0x60   :  { %207 = vmatprep.subr.mxu0 %v1830_v57  ;;  %368 = vmatpush2.msra.mxu1 %v1826_v56 }
  0x61   :  { %208 = vmatpush2.msra.mxu0 %v1834_v58  ;;  %369 = vmatprep.subr.mxu1 %v1830_v57  ;;  %v83_v57 = vld [vmem:[#allocation3] sm:$0xff] }
  0x62   :  { %209 = vmatprep.subr.mxu0 %v1838_v59  ;;  %370 = vmatpush2.msra.mxu1 %v1834_v58 }
  0x63   :  { %210 = vmatpush2.msra.mxu0 %v1842_v60  ;;  %371 = vmatprep.subr.mxu1 %v1838_v59 }
  0x64   :  { %211 = vmatprep.subr.mxu0 %v1846_v61  ;;  %372 = vmatpush2.msra.mxu1 %v1842_v60 }
  0x65   :  { %212 = vmatpush2.msra.mxu0 %v1850_v62  ;;  %373 = vmatprep.subr.mxu1 %v1846_v61 }
  0x66   :  { %213 = vmatprep.subr.mxu0 %v1854_v63  ;;  %374 = vmatpush2.msra.mxu1 %v1850_v62 }
  0x67   :  { %214 = vmatpush2.msra.mxu0 %v1858_v24  ;;  %375 = vmatprep.subr.mxu1 %v1854_v63 }
  0x68   :  { %216 = vmatmul.mubr.f32.vlgmr.msra.gmra.mxu0 %v83_v57  ;;  %376 = vmatpush2.msra.mxu1 %v1858_v24  ;;  %v68_v57 = vlaneseq }
  0x69   :  { %476 = vmatprep.subr.mxu0 %v1612_v0  ;;  %639 = vmatprep.subr.mxu1 %v1612_v0  ;;  %v2483_v0 = vld [vmem:[#allocation20_spill] sm:$0xff] }
  0x6a   :  { %477 = vmatpush1.msra.mxu0 %v1614_v1 }
  0x6b   :  { %478 = vmatprep.subr.mxu0 %v1616_v2 }
  0x6c   :  { %479 = vmatpush1.msra.mxu0 %v1619_v3 }
  0x6d   :  { %480 = vmatprep.subr.mxu0 %v1623_v4 }
  0x6e   :  { %481 = vmatpush1.msra.mxu0 %v1627_v5 }
  0x6f   :  { %482 = vmatprep.subr.mxu0 %v1631_v6 }
  0x70   :  { %483 = vmatpush1.msra.mxu0 %v1635_v7 }
  0x71   :  { %484 = vmatprep.subr.mxu0 %v1639_v8 }
  0x72   :  { %485 = vmatpush1.msra.mxu0 %v1643_v9 }
  0x73   :  { %486 = vmatprep.subr.mxu0 %v1647_v10 }
  0x74   :  { %487 = vmatpush1.msra.mxu0 %v1651_v11 }
  0x75   :  { %488 = vmatprep.subr.mxu0 %v1655_v12 }
  0x76   :  { %489 = vmatpush1.msra.mxu0 %v1659_v13 }
  0x77   :  { %490 = vmatprep.subr.mxu0 %v1663_v14 }
  0x78   :  { %491 = vmatpush1.msra.mxu0 %v1667_v15 }
  0x79   :  { %492 = vmatprep.subr.mxu0 %v1671_v16 }
  0x7a   :  { %493 = vmatpush1.msra.mxu0 %v1675_v17 }
  0x7b   :  { %494 = vmatprep.subr.mxu0 %v1679_v18 }
  0x7c   :  { %495 = vmatpush1.msra.mxu0 %v1683_v19 }
  0x7d   :  { %496 = vmatprep.subr.mxu0 %v1687_v20 }
  0x7e   :  { %497 = vmatpush1.msra.mxu0 %v1691_v21 }
  0x7f   :  { %498 = vmatprep.subr.mxu0 %v1695_v22 }
  0x80   :  { %499 = vmatpush1.msra.mxu0 %v1699_v23 }
  0x81   :  { %500 = vmatprep.subr.mxu0 %v1703_v25 }
  0x82   :  { %501 = vmatpush1.msra.mxu0 %v1706_v26 }
  0x83   :  { %502 = vmatprep.subr.mxu0 %v1710_v27 }
  0x84   :  { %503 = vmatpush1.msra.mxu0 %v1714_v28 }
  0x85   :  { %504 = vmatprep.subr.mxu0 %v1718_v29 }
  0x86   :  { %505 = vmatpush1.msra.mxu0 %v1722_v30 }
  0x87   :  { %506 = vmatprep.subr.mxu0 %v1726_v31 }
  0x88   :  { %507 = vmatpush1.msra.mxu0 %v1730_v32 }
  0x89   :  { %508 = vmatprep.subr.mxu0 %v1734_v33 }
  0x8a   :  { %509 = vmatpush2.msra.mxu0 %v1738_v34 }
  0x8b   :  { %510 = vmatprep.subr.mxu0 %v1742_v35 }
  0x8c   :  { %511 = vmatpush2.msra.mxu0 %v1746_v36 }
  0x8d   :  { %512 = vmatprep.subr.mxu0 %v1750_v37 }
  0x8e   :  { %513 = vmatpush2.msra.mxu0 %v1754_v38 }
  0x8f   :  { %514 = vmatprep.subr.mxu0 %v1758_v39 }
  0x90   :  { %515 = vmatpush2.msra.mxu0 %v1762_v40 }
  0x91   :  { %516 = vmatprep.subr.mxu0 %v1766_v41 }
  0x92   :  { %517 = vmatpush2.msra.mxu0 %v1770_v42 }
  0x93   :  { %518 = vmatprep.subr.mxu0 %v1774_v43 }
  0x94   :  { %519 = vmatpush2.msra.mxu0 %v1778_v44 }
  0x95   :  { %520 = vmatprep.subr.mxu0 %v1782_v45 }
  0x96   :  { %521 = vmatpush2.msra.mxu0 %v1786_v46 }
  0x97   :  { %522 = vmatprep.subr.mxu0 %v1790_v47 }
  0x98   :  { %523 = vmatpush2.msra.mxu0 %v1794_v48 }
  0x99   :  { %524 = vmatprep.subr.mxu0 %v1798_v49 }
  0x9a   :  { %525 = vmatpush2.msra.mxu0 %v1802_v50 }
  0x9b   :  { %526 = vmatprep.subr.mxu0 %v1806_v51 }
  0x9c   :  { %527 = vmatpush2.msra.mxu0 %v1810_v52 }
  0x9d   :  { %528 = vmatprep.subr.mxu0 %v1814_v53 }
  0x9e   :  { %529 = vmatpush2.msra.mxu0 %v1818_v54 }
  0x9f   :  { %530 = vmatprep.subr.mxu0 %v1822_v55  ;;  %v69_v55 = vshrl.u32 %v68_v57, 7  ;;  %v2169_v57 = vld [vmem:[#allocation8 + $0x1c0] sm:$0xff] }
  0xa0   :  { %531 = vmatpush2.msra.mxu0 %v1826_v56 }
  0xa1   :  { %532 = vmatprep.subr.mxu0 %v2483_v0  ;;  %v70_v54 = vsub.s32 0, %v69_v55  ;;  %v66_v0 = vld [vmem:[%s2435_s3] sm:$0x3]  ;;  %s1568_s3 = smov [#allocation10]  }
  0xa2   :  { %533 = vmatpush2.msra.mxu0 %v1834_v58  ;;  %v74_v58 = vsub.s32 1, %v69_v55  ;;  %v2141_v55 = vld [vmem:[#allocation8 + $0x1f8] sm:$0xff]  ;;  %s1398_s11 = sshll.u32 %s1568_s3, 4  ;;  %s1399_s11 = int_to_ptr.vmem [resolvable:$true] %s1398_s11 }
  0xa3   :  { %534 = vmatprep.subr.mxu0 %v1838_v59  ;;  %v1936_v56 = vrot.slane %v66_v0, %v70_v54  ;;  %v2137_v54 = vld [vmem:[#allocation8] sm:$0xff]  ;;  %s1513_s12 = scalar_lea.vmem %s1399_s11, 128  ;;  %p1518_p2 = scmp.lt.s32.totalorder %s1399_s11, %s1399_s11 }
  0xa4   :  { %535 = vmatpush2.msra.mxu0 %v1842_v60  ;;  %v1938_v59 = vrot.slane %v66_v0, %v74_v58  ;;  %v2145_v58 = vld [vmem:[#allocation8 + $0x1f0] sm:$0xff]  ;;  %v2165_v0 = vld [vmem:[#allocation8 + $0x1c8] sm:$0xff]  ;;  %p1514_p1 = scmp.ne.s32.totalorder %s1399_s11, %s1513_s12  ;;  %p1519_p3 = scmp.lt.s32.totalorder %s1513_s12, %s1513_s12 }
  0xa5   :  { %536 = vmatprep.subr.mxu0 %v1846_v61 }
  0xa6   :  { %537 = vmatpush2.msra.mxu0 %v1850_v62  ;;  %v245_v62 = vld [vmem:[#allocation3 + $0x8] sm:$0xff]  ;;  %p1520_p4 = por %p1519_p3, %p1518_p2 }
  0xa7   :  { %538 = vmatprep.subr.mxu0 %v1854_v63 }
  0xa8   :  { %539 = vmatpush2.msra.mxu0 %v1858_v24  ;;  %p1521_p5 = pnand %p1520_p4, %p1514_p1 }
 0x128   :  { %v217_v60 = vpop.f32.mrf.mxu0 }
 0x129   :  { %v218_v61 = vadd.f32 %v217_v60, %v1936_v56  ;;  %v2149_v60 = vld [vmem:[#allocation8 + $0x1e8] sm:$0xff] }
 0x12a   :  { %v219_v53 = vpop.f32.mrf.mxu0 }
 0x12b   :  { %v1942_v63 = vadd.f32 %v219_v53, %v1938_v59  ;;  %377 = vmatprep.mubr.f32.mxu1 %v218_v61  ;;  %v2133_v53 = vld [vmem:[#allocation8 + $0x8] sm:$0xff]  ;;  %v2153_v61 = vld [vmem:[#allocation8 + $0x1e0] sm:$0xff] }
 0x12c   :  { %378 = vmatmul.mubr.f32.vlgmr.msra.gmra.mxu1 %v245_v62  ;;  %v2157_v62 = vld [vmem:[#allocation8 + $0x1d8] sm:$0xff] }
 0x12d   :  { %2484 = vst [vmem:[#allocation27_spill] sm:$0xff] %v1942_v63  ;;  %222 = vmax.xlane.f32.xlu0 %v1942_v63  ;;  %640 = vmatpush1.msra.mxu1 %v1614_v1  ;;  %v2485_v1 = vld [vmem:[#allocation16_spill] sm:$0xff]  ;;  %v2261_v63 = vld [vmem:[#allocation8 + $0x110] sm:$0xff] }
 0x12e   :  { %641 = vmatprep.subr.mxu1 %v1616_v2  ;;  %v2486_v2 = vld [vmem:[#allocation17_spill] sm:$0xff]  ;;  %2508 = vst [vmem:[#allocation29_spill] sm:$0xff] %v2261_v63 }
 0x12f   :  { %642 = vmatpush1.msra.mxu1 %v1619_v3  ;;  %v2487_v3 = vld [vmem:[#allocation18_spill] sm:$0xff] }
 0x130   :  { %643 = vmatprep.subr.mxu1 %v1623_v4  ;;  %v2488_v4 = vld [vmem:[#allocation19_spill] sm:$0xff] }
 0x131   :  { %644 = vmatpush1.msra.mxu1 %v1627_v5  ;;  %v2489_v5 = vld [vmem:[#allocation20_spill] sm:$0xff] }
 0x132   :  { %645 = vmatprep.subr.mxu1 %v1631_v6  ;;  %v2490_v6 = vld [vmem:[#allocation21_spill] sm:$0xff] }
 0x133   :  { %646 = vmatpush1.msra.mxu1 %v1635_v7  ;;  %v2491_v7 = vld [vmem:[#allocation22_spill] sm:$0xff] }
 0x134   :  { %647 = vmatprep.subr.mxu1 %v1639_v8  ;;  %v2492_v8 = vld [vmem:[#allocation23_spill] sm:$0xff] }
 0x135   :  { %648 = vmatpush1.msra.mxu1 %v1643_v9  ;;  %v2493_v9 = vld [vmem:[#allocation24_spill] sm:$0xff] }
 0x136   :  { %649 = vmatprep.subr.mxu1 %v1647_v10  ;;  %v2494_v10 = vld [vmem:[#allocation25_spill] sm:$0xff] }
 0x137   :  { %650 = vmatpush1.msra.mxu1 %v1651_v11  ;;  %v2495_v11 = vld [vmem:[#allocation26_spill] sm:$0xff] }
 0x138   :  { %651 = vmatprep.subr.mxu1 %v1655_v12 }
 0x139   :  { %652 = vmatpush1.msra.mxu1 %v1659_v13 }
 0x13a   :  { %653 = vmatprep.subr.mxu1 %v1663_v14  ;;  %v408_v14 = vld [vmem:[#allocation3 + $0x10] sm:$0xff] }
 0x13b   :  { %654 = vmatpush1.msra.mxu1 %v1667_v15 }
 0x13c   :  { %655 = vmatprep.subr.mxu1 %v1671_v16 }
 0x13d   :  { %656 = vmatpush1.msra.mxu1 %v1675_v17  ;;  %v2013_v17 = vld [vmem:[#allocation8 + $0xf8] sm:$0xff] }
 0x13e   :  { %657 = vmatprep.subr.mxu1 %v1679_v18  ;;  %v2015_v18 = vld [vmem:[#allocation8 + $0xf0] sm:$0xff]  ;;  %802 = vmatprep.subr.mxu0 %v2013_v17 }
 0x13f   :  { %658 = vmatpush1.msra.mxu1 %v1683_v19  ;;  %v2017_v19 = vld [vmem:[#allocation8 + $0xe8] sm:$0xff] }
 0x140   :  { %659 = vmatprep.subr.mxu1 %v1687_v20  ;;  %v2020_v20 = vld [vmem:[#allocation8 + $0xe0] sm:$0xff] }
 0x141   :  { %660 = vmatpush1.msra.mxu1 %v1691_v21  ;;  %v2024_v21 = vld [vmem:[#allocation8 + $0xd8] sm:$0xff] }
 0x142   :  { %661 = vmatprep.subr.mxu1 %v1695_v22  ;;  %v2027_v22 = vld [vmem:[#allocation8 + $0xd0] sm:$0xff] }
 0x143   :  { %662 = vmatpush1.msra.mxu1 %v1699_v23  ;;  %v2030_v23 = vld [vmem:[#allocation8 + $0xc8] sm:$0xff] }
 0x144   :  { %663 = vmatprep.subr.mxu1 %v1703_v25 }
 0x145   :  { %664 = vmatpush1.msra.mxu1 %v1706_v26 }
 0x146   :  { %665 = vmatprep.subr.mxu1 %v1710_v27  ;;  %v571_v27 = vld [vmem:[#allocation3 + $0x18] sm:$0xff] }
 0x147   :  { %666 = vmatpush1.msra.mxu1 %v1714_v28 }
 0x148   :  { %667 = vmatprep.subr.mxu1 %v1718_v29 }
 0x149   :  { %668 = vmatpush1.msra.mxu1 %v1722_v30  ;;  %v2046_v30 = vld [vmem:[#allocation8 + $0xc0] sm:$0xff] }
 0x14a   :  { %669 = vmatprep.subr.mxu1 %v1726_v31  ;;  %v2049_v31 = vld [vmem:[#allocation8 + $0xb8] sm:$0xff] }
 0x14b   :  { %670 = vmatpush1.msra.mxu1 %v1730_v32  ;;  %v2053_v32 = vld [vmem:[#allocation8 + $0xb0] sm:$0xff] }
 0x14c   :  { %671 = vmatprep.subr.mxu1 %v1734_v33  ;;  %v2057_v33 = vld [vmem:[#allocation8 + $0xa8] sm:$0xff] }
 0x14d   :  { %672 = vmatpush2.msra.mxu1 %v1738_v34  ;;  %v2061_v34 = vld [vmem:[#allocation8 + $0xa0] sm:$0xff] }
 0x14e   :  { %673 = vmatprep.subr.mxu1 %v1742_v35  ;;  %v2065_v35 = vld [vmem:[#allocation8 + $0x98] sm:$0xff] }
 0x14f   :  { %674 = vmatpush2.msra.mxu1 %v1746_v36  ;;  %v2067_v36 = vld [vmem:[#allocation8 + $0x90] sm:$0xff] }
 0x150   :  { %675 = vmatprep.subr.mxu1 %v1750_v37  ;;  %v2069_v37 = vld [vmem:[#allocation8 + $0x88] sm:$0xff] }
 0x151   :  { %676 = vmatpush2.msra.mxu1 %v1754_v38  ;;  %v2073_v38 = vld [vmem:[#allocation8 + $0x80] sm:$0xff] }
 0x152   :  { %677 = vmatprep.subr.mxu1 %v1758_v39  ;;  %v2077_v39 = vld [vmem:[#allocation8 + $0x78] sm:$0xff] }
 0x153   :  { %678 = vmatpush2.msra.mxu1 %v1762_v40  ;;  %v2081_v40 = vld [vmem:[#allocation8 + $0x70] sm:$0xff] }
 0x154   :  { %679 = vmatprep.subr.mxu1 %v1766_v41  ;;  %v2085_v41 = vld [vmem:[#allocation8 + $0x68] sm:$0xff] }
 0x155   :  { %680 = vmatpush2.msra.mxu1 %v1770_v42  ;;  %v2089_v42 = vld [vmem:[#allocation8 + $0x60] sm:$0xff] }
 0x156   :  { %681 = vmatprep.subr.mxu1 %v1774_v43  ;;  %v2093_v43 = vld [vmem:[#allocation8 + $0x58] sm:$0xff] }
 0x157   :  { %682 = vmatpush2.msra.mxu1 %v1778_v44  ;;  %v2097_v44 = vld [vmem:[#allocation8 + $0x50] sm:$0xff] }
 0x158   :  { %683 = vmatprep.subr.mxu1 %v1782_v45  ;;  %v2101_v45 = vld [vmem:[#allocation8 + $0x48] sm:$0xff] }
 0x159   :  { %684 = vmatpush2.msra.mxu1 %v1786_v46  ;;  %v2105_v46 = vld [vmem:[#allocation8 + $0x40] sm:$0xff] }
 0x15a   :  { %685 = vmatprep.subr.mxu1 %v1790_v47  ;;  %v2109_v47 = vld [vmem:[#allocation8 + $0x38] sm:$0xff] }
 0x15b   :  { %686 = vmatpush2.msra.mxu1 %v1794_v48  ;;  %v2113_v48 = vld [vmem:[#allocation8 + $0x30] sm:$0xff] }
 0x15c   :  { %687 = vmatprep.subr.mxu1 %v1798_v49  ;;  %v2117_v49 = vld [vmem:[#allocation8 + $0x28] sm:$0xff] }
 0x15d   :  { %688 = vmatpush2.msra.mxu1 %v1802_v50  ;;  %v2121_v50 = vld [vmem:[#allocation8 + $0x20] sm:$0xff] }
 0x15e   :  { %689 = vmatprep.subr.mxu1 %v1806_v51  ;;  %v2125_v51 = vld [vmem:[#allocation8 + $0x18] sm:$0xff] }
 0x15f   :  { %690 = vmatpush2.msra.mxu1 %v1810_v52  ;;  %v2129_v52 = vld [vmem:[#allocation8 + $0x10] sm:$0xff] }
 0x160   :  { %691 = vmatprep.subr.mxu1 %v2485_v1  ;;  %v2173_v1 = vld [vmem:[#allocation8 + $0x1b8] sm:$0xff] }
 0x161   :  { %692 = vmatpush2.msra.mxu1 %v2486_v2  ;;  %v2177_v2 = vld [vmem:[#allocation8 + $0x1b0] sm:$0xff] }
 0x162   :  { %693 = vmatprep.subr.mxu1 %v2487_v3  ;;  %v2181_v3 = vld [vmem:[#allocation8 + $0x1a8] sm:$0xff] }
 0x163   :  { %694 = vmatpush2.msra.mxu1 %v2488_v4  ;;  %v2185_v4 = vld [vmem:[#allocation8 + $0x1a0] sm:$0xff] }
 0x164   :  { %695 = vmatprep.subr.mxu1 %v2489_v5  ;;  %v2189_v5 = vld [vmem:[#allocation8 + $0x198] sm:$0xff] }
 0x165   :  { %696 = vmatpush2.msra.mxu1 %v2490_v6  ;;  %v2193_v6 = vld [vmem:[#allocation8 + $0x190] sm:$0xff] }
 0x166   :  { %697 = vmatprep.subr.mxu1 %v2491_v7  ;;  %v2197_v7 = vld [vmem:[#allocation8 + $0x188] sm:$0xff] }
 0x167   :  { %698 = vmatpush2.msra.mxu1 %v2492_v8  ;;  %v2201_v8 = vld [vmem:[#allocation8 + $0x180] sm:$0xff] }
 0x168   :  { %699 = vmatprep.subr.mxu1 %v2493_v9  ;;  %v2205_v9 = vld [vmem:[#allocation8 + $0x178] sm:$0xff] }
 0x169   :  { %700 = vmatpush2.msra.mxu1 %v2494_v10  ;;  %v2209_v10 = vld [vmem:[#allocation8 + $0x170] sm:$0xff] }
 0x16a   :  { %701 = vmatprep.subr.mxu1 %v2495_v11  ;;  %v2213_v11 = vld [vmem:[#allocation8 + $0x168] sm:$0xff] }
 0x16b   :  { %702 = vmatpush2.msra.mxu1 %v1858_v24  ;;  %v2161_v24 = vld [vmem:[#allocation8 + $0x1d0] sm:$0xff]  ;;  %2498 = vst [vmem:[#allocation18_spill] sm:$0xff] %v2213_v11 }
 0x16c   :  { %965 = vmatprep.subr.mxu1 %v2013_v17 }
 0x1ec   :  { %v379_v12 = vpop.f32.mrf.mxu1 }
 0x1ed   :  { %v380_v13 = vadd.f32 %v379_v12, %v1936_v56  ;;  %v2217_v12 = vld [vmem:[#allocation8 + $0x160] sm:$0xff] }
 0x1ee   :  { %v381_v15 = vpop.f32.mrf.mxu1 }
 0x1ef   :  { %v2010_v16 = vadd.f32 %v381_v15, %v1938_v59  ;;  %540 = vmatprep.mubr.f32.mxu0 %v380_v13  ;;  %v2221_v13 = vld [vmem:[#allocation8 + $0x158] sm:$0xff]  ;;  %v2229_v15 = vld [vmem:[#allocation8 + $0x148] sm:$0xff] }
 0x1f0   :  { %541 = vmatmul.mubr.f32.vlgmr.msra.gmra.mxu0 %v408_v14  ;;  %2499 = vst [vmem:[#allocation19_spill] sm:$0xff] %v2221_v13  ;;  %v2225_v14 = vld [vmem:[#allocation8 + $0x150] sm:$0xff]  ;;  %2501 = vst [vmem:[#allocation21_spill] sm:$0xff] %v2229_v15 }
 0x1f1   :  { %2496 = vst [vmem:[#allocation16_spill] sm:$0xff] %v2010_v16  ;;  %384 = vmax.xlane.f32.xlu0 %v2010_v16  ;;  %803 = vmatpush1.msra.mxu0 %v2015_v18  ;;  %2500 = vst [vmem:[#allocation20_spill] sm:$0xff] %v2225_v14  ;;  %v2249_v16 = vld [vmem:[#allocation8 + $0x120] sm:$0xff] }
 0x1f2   :  { %804 = vmatprep.subr.mxu0 %v2017_v19  ;;  %2506 = vst [vmem:[#allocation26_spill] sm:$0xff] %v2249_v16 }
 0x1f3   :  { %805 = vmatpush1.msra.mxu0 %v2020_v20 }
 0x1f4   :  { %806 = vmatprep.subr.mxu0 %v2024_v21 }
 0x1f5   :  { %807 = vmatpush1.msra.mxu0 %v2027_v22 }
 0x1f6   :  { %808 = vmatprep.subr.mxu0 %v2030_v23 }
 0x1f7   :  { %809 = vmatpush1.msra.mxu0 %v2046_v30 }
 0x1f8   :  { %810 = vmatprep.subr.mxu0 %v2049_v31 }
 0x1f9   :  { %811 = vmatpush1.msra.mxu0 %v2053_v32 }
 0x1fa   :  { %812 = vmatprep.subr.mxu0 %v2057_v33 }
 0x1fb   :  { %813 = vmatpush1.msra.mxu0 %v2061_v34 }
 0x1fc   :  { %814 = vmatprep.subr.mxu0 %v2065_v35 }
 0x1fd   :  { %815 = vmatpush1.msra.mxu0 %v2067_v36 }
 0x1fe   :  { %816 = vmatprep.subr.mxu0 %v2069_v37 }
 0x1ff   :  { %817 = vmatpush1.msra.mxu0 %v2073_v38 }
 0x200   :  { %818 = vmatprep.subr.mxu0 %v2077_v39 }
 0x201   :  { %819 = vmatpush1.msra.mxu0 %v2081_v40 }
 0x202   :  { %820 = vmatprep.subr.mxu0 %v2085_v41 }
 0x203   :  { %821 = vmatpush1.msra.mxu0 %v2089_v42 }
 0x204   :  { %822 = vmatprep.subr.mxu0 %v2093_v43 }
 0x205   :  { %823 = vmatpush1.msra.mxu0 %v2097_v44 }
 0x206   :  { %824 = vmatprep.subr.mxu0 %v2101_v45 }
 0x207   :  { %825 = vmatpush1.msra.mxu0 %v2105_v46 }
 0x208   :  { %826 = vmatprep.subr.mxu0 %v2109_v47 }
 0x209   :  { %827 = vmatpush1.msra.mxu0 %v2113_v48 }
 0x20a   :  { %828 = vmatprep.subr.mxu0 %v2117_v49 }
 0x20b   :  { %829 = vmatpush1.msra.mxu0 %v2121_v50 }
 0x20c   :  { %830 = vmatprep.subr.mxu0 %v2125_v51 }
 0x20d   :  { %831 = vmatpush1.msra.mxu0 %v2129_v52 }
 0x20e   :  { %832 = vmatprep.subr.mxu0 %v2133_v53 }
 0x20f   :  { %833 = vmatpush1.msra.mxu0 %v2137_v54 }
 0x210   :  { %834 = vmatprep.subr.mxu0 %v2141_v55 }
 0x211   :  { %835 = vmatpush2.msra.mxu0 %v2145_v58 }
 0x212   :  { %836 = vmatprep.subr.mxu0 %v2149_v60 }
 0x213   :  { %837 = vmatpush2.msra.mxu0 %v2153_v61 }
 0x214   :  { %838 = vmatprep.subr.mxu0 %v2157_v62 }
 0x215   :  { %839 = vmatpush2.msra.mxu0 %v2161_v24 }
 0x216   :  { %840 = vmatprep.subr.mxu0 %v2165_v0 }
 0x217   :  { %841 = vmatpush2.msra.mxu0 %v2169_v57 }
 0x218   :  { %842 = vmatprep.subr.mxu0 %v2173_v1 }
 0x219   :  { %843 = vmatpush2.msra.mxu0 %v2177_v2 }
 0x21a   :  { %844 = vmatprep.subr.mxu0 %v2181_v3 }
 0x21b   :  { %845 = vmatpush2.msra.mxu0 %v2185_v4 }
 0x21c   :  { %846 = vmatprep.subr.mxu0 %v2189_v5 }
 0x21d   :  { %847 = vmatpush2.msra.mxu0 %v2193_v6 }
 0x21e   :  { %848 = vmatprep.subr.mxu0 %v2197_v7 }
 0x21f   :  { %849 = vmatpush2.msra.mxu0 %v2201_v8 }
 0x220   :  { %850 = vmatprep.subr.mxu0 %v2205_v9 }
 0x221   :  { %851 = vmatpush2.msra.mxu0 %v2209_v10 }
 0x222   :  { %852 = vmatprep.subr.mxu0 %v2213_v11 }
 0x223   :  { %853 = vmatpush2.msra.mxu0 %v2217_v12 }
 0x224   :  { %854 = vmatprep.subr.mxu0 %v2221_v13 }
 0x225   :  { %855 = vmatpush2.msra.mxu0 %v2225_v14 }
 0x226   :  { %856 = vmatprep.subr.mxu0 %v2229_v15 }
 0x2b0   :  { %v542_v25 = vpop.f32.mrf.mxu0 }
 0x2b1   :  { %v543_v26 = vadd.f32 %v542_v25, %v1936_v56  ;;  %v2233_v25 = vld [vmem:[#allocation8 + $0x140] sm:$0xff] }
 0x2b2   :  { %v544_v28 = vpop.f32.mrf.mxu0  ;;  %2502 = vst [vmem:[#allocation22_spill] sm:$0xff] %v2233_v25  ;;  %857 = vmatpush2.msra.mxu0 %v2233_v25 }
 0x2b3   :  { %v2037_v29 = vadd.f32 %v544_v28, %v1938_v59  ;;  %703 = vmatprep.mubr.f32.mxu1 %v543_v26  ;;  %v2237_v26 = vld [vmem:[#allocation8 + $0x138] sm:$0xff]  ;;  %v2245_v28 = vld [vmem:[#allocation8 + $0x128] sm:$0xff] }
 0x2b4   :  { %704 = vmatmul.mubr.f32.vlgmr.msra.gmra.mxu1 %v571_v27  ;;  %2503 = vst [vmem:[#allocation23_spill] sm:$0xff] %v2237_v26  ;;  %v2241_v27 = vld [vmem:[#allocation8 + $0x130] sm:$0xff]  ;;  %2505 = vst [vmem:[#allocation25_spill] sm:$0xff] %v2245_v28  ;;  %858 = vmatprep.subr.mxu0 %v2237_v26 }
 0x2b5   :  { %2497 = vst [vmem:[#allocation17_spill] sm:$0xff] %v2037_v29  ;;  %547 = vmax.xlane.f32.xlu1 %v2037_v29  ;;  %966 = vmatpush1.msra.mxu1 %v2015_v18  ;;  %2504 = vst [vmem:[#allocation24_spill] sm:$0xff] %v2241_v27  ;;  %v2257_v29 = vld [vmem:[#allocation8 + $0x118] sm:$0xff] }
 0x2b6   :  { %967 = vmatprep.subr.mxu1 %v2017_v19  ;;  %859 = vmatpush2.msra.mxu0 %v2241_v27  ;;  %2507 = vst [vmem:[#allocation28_spill] sm:$0xff] %v2257_v29 }
 0x2b7   :  { %968 = vmatpush1.msra.mxu1 %v2020_v20  ;;  %860 = vmatprep.subr.mxu0 %v2245_v28 }
 0x2b8   :  { %969 = vmatprep.subr.mxu1 %v2024_v21  ;;  %861 = vmatpush2.msra.mxu0 %v2249_v16 }
 0x2b9   :  { %970 = vmatpush1.msra.mxu1 %v2027_v22  ;;  %862 = vmatprep.subr.mxu0 %v2257_v29 }
 0x2ba   :  { %971 = vmatprep.subr.mxu1 %v2030_v23  ;;  %863 = vmatpush2.msra.mxu0 %v2261_v63 }
 0x2bb   :  { %972 = vmatpush1.msra.mxu1 %v2046_v30 }
 0x2bc   :  { %973 = vmatprep.subr.mxu1 %v2049_v31 }
 0x2bd   :  { %974 = vmatpush1.msra.mxu1 %v2053_v32 }
 0x2be   :  { %975 = vmatprep.subr.mxu1 %v2057_v33 }
 0x2bf   :  { %976 = vmatpush1.msra.mxu1 %v2061_v34 }
 0x2c0   :  { %977 = vmatprep.subr.mxu1 %v2065_v35 }
 0x2c1   :  { %978 = vmatpush1.msra.mxu1 %v2067_v36 }
 0x2c2   :  { %979 = vmatprep.subr.mxu1 %v2069_v37 }
 0x2c3   :  { %980 = vmatpush1.msra.mxu1 %v2073_v38 }
 0x2c4   :  { %981 = vmatprep.subr.mxu1 %v2077_v39 }
 0x2c5   :  { %982 = vmatpush1.msra.mxu1 %v2081_v40 }
 0x2c6   :  { %983 = vmatprep.subr.mxu1 %v2085_v41 }
 0x2c7   :  { %984 = vmatpush1.msra.mxu1 %v2089_v42 }
 0x2c8   :  { %985 = vmatprep.subr.mxu1 %v2093_v43 }
 0x2c9   :  { %986 = vmatpush1.msra.mxu1 %v2097_v44 }
 0x2ca   :  { %987 = vmatprep.subr.mxu1 %v2101_v45 }
 0x2cb   :  { %988 = vmatpush1.msra.mxu1 %v2105_v46 }
 0x2cc   :  { %989 = vmatprep.subr.mxu1 %v2109_v47 }
 0x2cd   :  { %990 = vmatpush1.msra.mxu1 %v2113_v48 }
 0x2ce   :  { %991 = vmatprep.subr.mxu1 %v2117_v49 }
 0x2cf   :  { %992 = vmatpush1.msra.mxu1 %v2121_v50 }
 0x2d0   :  { %993 = vmatprep.subr.mxu1 %v2125_v51 }
 0x2d1   :  { %994 = vmatpush1.msra.mxu1 %v2129_v52 }
 0x2d2   :  { %995 = vmatprep.subr.mxu1 %v2133_v53 }
 0x2d3   :  { %996 = vmatpush1.msra.mxu1 %v2137_v54 }
 0x2d4   :  { %997 = vmatprep.subr.mxu1 %v2141_v55 }
 0x2d5   :  { %998 = vmatpush2.msra.mxu1 %v2145_v58 }
 0x2d6   :  { %999 = vmatprep.subr.mxu1 %v2149_v60 }
 0x2d7   :  { %1000 = vmatpush2.msra.mxu1 %v2153_v61 }
 0x2d8   :  { %1001 = vmatprep.subr.mxu1 %v2157_v62 }
 0x2d9   :  { %1002 = vmatpush2.msra.mxu1 %v2161_v24 }
 0x2da   :  { %1003 = vmatprep.subr.mxu1 %v2165_v0 }
 0x2db   :  { %1004 = vmatpush2.msra.mxu1 %v2169_v57 }
 0x2dc   :  { %1005 = vmatprep.subr.mxu1 %v2173_v1 }
 0x2dd   :  { %1006 = vmatpush2.msra.mxu1 %v2177_v2 }
 0x2de   :  { %1007 = vmatprep.subr.mxu1 %v2181_v3 }
 0x2df   :  { %1008 = vmatpush2.msra.mxu1 %v2185_v4 }
 0x2e0   :  { %1009 = vmatprep.subr.mxu1 %v2189_v5 }
 0x2e1   :  { %1010 = vmatpush2.msra.mxu1 %v2193_v6 }
 0x2e2   :  { %1011 = vmatprep.subr.mxu1 %v2197_v7 }
 0x2e3   :  { %1012 = vmatpush2.msra.mxu1 %v2201_v8 }
 0x2e4   :  { %1013 = vmatprep.subr.mxu1 %v2205_v9 }
 0x2e5   :  { %1014 = vmatpush2.msra.mxu1 %v2209_v10 }
 0x2e6   :  { %1015 = vmatprep.subr.mxu1 %v2213_v11 }
 0x2e7   :  { %1016 = vmatpush2.msra.mxu1 %v2217_v12 }
 0x2e8   :  { %1017 = vmatprep.subr.mxu1 %v2221_v13 }
 0x2e9   :  { %1018 = vmatpush2.msra.mxu1 %v2225_v14 }
 0x2ea   :  { %1019 = vmatprep.subr.mxu1 %v2229_v15 }
 0x2eb   :  { %1020 = vmatpush2.msra.mxu1 %v2233_v25 }
 0x2ec   :  { %1021 = vmatprep.subr.mxu1 %v2237_v26  ;;  %v2265_v26 = vld [vmem:[#allocation8 + $0x108] sm:$0xff] }
 0x2ed   :  { %1022 = vmatpush2.msra.mxu1 %v2241_v27  ;;  %864 = vmatprep.subr.mxu0 %v2265_v26  ;;  %v734_v27 = vld [vmem:[#allocation3 + $0x20] sm:$0xff] }
 0x2ee   :  { %1023 = vmatprep.subr.mxu1 %v2245_v28  ;;  %v2269_v28 = vld [vmem:[#allocation8 + $0x100] sm:$0xff] }
 0x2ef   :  { %1024 = vmatpush2.msra.mxu1 %v2249_v16  ;;  %865 = vmatpush2.msra.mxu0 %v2269_v28 }
 0x2f0   :  { %1025 = vmatprep.subr.mxu1 %v2257_v29  ;;  %1128 = vmatprep.subr.mxu0 %v2013_v17 }
 0x2f1   :  { %1026 = vmatpush2.msra.mxu1 %v2261_v63 }
 0x2f2   :  { %1027 = vmatprep.subr.mxu1 %v2265_v26 }
 0x2f3   :  { %1028 = vmatpush2.msra.mxu1 %v2269_v28 }
 0x2f4   :  { %1291 = vmatprep.subr.mxu1 %v2013_v17  ;;  %v2511_v17 = vld [vmem:[#allocation23_spill] sm:$0xff] }
 0x374   :  { %v705_v29 = vpop.f32.mrf.mxu1 }
 0x375   :  { %v706_v16 = vadd.f32 %v705_v29, %v1936_v56  ;;  %v2512_v29 = vld [vmem:[#allocation24_spill] sm:$0xff] }
 0x376   :  { %v707_v25 = vpop.f32.mrf.mxu1 }
 0x377   :  { %v2278_v63 = vadd.f32 %v707_v25, %v1938_v59  ;;  %866 = vmatprep.mubr.f32.mxu0 %v706_v16  ;;  %v2510_v16 = vld [vmem:[#allocation22_spill] sm:$0xff]  ;;  %v2513_v25 = vld [vmem:[#allocation25_spill] sm:$0xff] }
 0x378   :  { %867 = vmatmul.mubr.f32.vlgmr.msra.gmra.mxu0 %v734_v27  ;;  %v2514_v27 = vld [vmem:[#allocation26_spill] sm:$0xff] }
 0x379   :  { %2509 = vst [vmem:[#allocation30_spill] sm:$0xff] %v2278_v63  ;;  %710 = vmax.xlane.f32.xlu1 %v2278_v63  ;;  %1129 = vmatpush1.msra.mxu0 %v2015_v18  ;;  %v2515_v63 = vld [vmem:[#allocation28_spill] sm:$0xff] }
 0x37a   :  { %1130 = vmatprep.subr.mxu0 %v2017_v19 }
 0x37b   :  { %1131 = vmatpush1.msra.mxu0 %v2020_v20 }
 0x37c   :  { %1132 = vmatprep.subr.mxu0 %v2024_v21 }
 0x37d   :  { %1133 = vmatpush1.msra.mxu0 %v2027_v22 }
 0x37e   :  { %1134 = vmatprep.subr.mxu0 %v2030_v23 }
 0x37f   :  { %1135 = vmatpush1.msra.mxu0 %v2046_v30 }
 0x380   :  { %1136 = vmatprep.subr.mxu0 %v2049_v31 }
 0x381   :  { %1137 = vmatpush1.msra.mxu0 %v2053_v32 }
 0x382   :  { %1138 = vmatprep.subr.mxu0 %v2057_v33 }
 0x383   :  { %1139 = vmatpush1.msra.mxu0 %v2061_v34 }
 0x384   :  { %1140 = vmatprep.subr.mxu0 %v2065_v35 }
 0x385   :  { %1141 = vmatpush1.msra.mxu0 %v2067_v36 }
 0x386   :  { %1142 = vmatprep.subr.mxu0 %v2069_v37 }
 0x387   :  { %1143 = vmatpush1.msra.mxu0 %v2073_v38 }
 0x388   :  { %1144 = vmatprep.subr.mxu0 %v2077_v39 }
 0x389   :  { %1145 = vmatpush1.msra.mxu0 %v2081_v40 }
 0x38a   :  { %1146 = vmatprep.subr.mxu0 %v2085_v41 }
 0x38b   :  { %1147 = vmatpush1.msra.mxu0 %v2089_v42 }
 0x38c   :  { %1148 = vmatprep.subr.mxu0 %v2093_v43 }
 0x38d   :  { %1149 = vmatpush1.msra.mxu0 %v2097_v44 }
 0x38e   :  { %1150 = vmatprep.subr.mxu0 %v2101_v45 }
 0x38f   :  { %1151 = vmatpush1.msra.mxu0 %v2105_v46 }
 0x390   :  { %1152 = vmatprep.subr.mxu0 %v2109_v47 }
 0x391   :  { %1153 = vmatpush1.msra.mxu0 %v2113_v48 }
 0x392   :  { %1154 = vmatprep.subr.mxu0 %v2117_v49 }
 0x393   :  { %1155 = vmatpush1.msra.mxu0 %v2121_v50 }
 0x394   :  { %1156 = vmatprep.subr.mxu0 %v2125_v51 }
 0x395   :  { %1157 = vmatpush1.msra.mxu0 %v2129_v52 }
 0x396   :  { %1158 = vmatprep.subr.mxu0 %v2133_v53 }
 0x397   :  { %1159 = vmatpush1.msra.mxu0 %v2137_v54 }
 0x398   :  { %1160 = vmatprep.subr.mxu0 %v2141_v55 }
 0x399   :  { %1161 = vmatpush2.msra.mxu0 %v2145_v58 }
 0x39a   :  { %1162 = vmatprep.subr.mxu0 %v2149_v60 }
 0x39b   :  { %1163 = vmatpush2.msra.mxu0 %v2153_v61 }
 0x39c   :  { %1164 = vmatprep.subr.mxu0 %v2157_v62 }
 0x39d   :  { %1165 = vmatpush2.msra.mxu0 %v2161_v24 }
 0x39e   :  { %1166 = vmatprep.subr.mxu0 %v2165_v0 }
 0x39f   :  { %1167 = vmatpush2.msra.mxu0 %v2169_v57 }
 0x3a0   :  { %1168 = vmatprep.subr.mxu0 %v2173_v1 }
 0x3a1   :  { %1169 = vmatpush2.msra.mxu0 %v2177_v2 }
 0x3a2   :  { %1170 = vmatprep.subr.mxu0 %v2181_v3 }
 0x3a3   :  { %1171 = vmatpush2.msra.mxu0 %v2185_v4 }
 0x3a4   :  { %1172 = vmatprep.subr.mxu0 %v2189_v5 }
 0x3a5   :  { %1173 = vmatpush2.msra.mxu0 %v2193_v6 }
 0x3a6   :  { %1174 = vmatprep.subr.mxu0 %v2197_v7 }
 0x3a7   :  { %1175 = vmatpush2.msra.mxu0 %v2201_v8 }
 0x3a8   :  { %1176 = vmatprep.subr.mxu0 %v2205_v9 }
 0x3a9   :  { %1177 = vmatpush2.msra.mxu0 %v2209_v10 }
 0x3aa   :  { %1178 = vmatprep.subr.mxu0 %v2213_v11  ;;  %v2516_v11 = vld [vmem:[#allocation29_spill] sm:$0xff] }
 0x3ab   :  { %1179 = vmatpush2.msra.mxu0 %v2217_v12 }
 0x3ac   :  { %1180 = vmatprep.subr.mxu0 %v2221_v13 }
 0x3ad   :  { %1181 = vmatpush2.msra.mxu0 %v2225_v14 }
 0x3ae   :  { %1182 = vmatprep.subr.mxu0 %v2229_v15 }
 0x3af   :  { %1183 = vmatpush2.msra.mxu0 %v2510_v16  ;;  %v897_v16 = vld [vmem:[#allocation3 + $0x28] sm:$0xff] }
 0x3b0   :  { %1184 = vmatprep.subr.mxu0 %v2511_v17 }
 0x3b1   :  { %1185 = vmatpush2.msra.mxu0 %v2512_v29 }
 0x3b2   :  { %1186 = vmatprep.subr.mxu0 %v2513_v25 }
 0x3b3   :  { %1187 = vmatpush2.msra.mxu0 %v2514_v27 }
 0x3b4   :  { %1188 = vmatprep.subr.mxu0 %v2515_v63 }
 0x3b5   :  { %1189 = vmatpush2.msra.mxu0 %v2516_v11 }
 0x3b6   :  { %1190 = vmatprep.subr.mxu0 %v2265_v26 }
 0x3b7   :  { %1191 = vmatpush2.msra.mxu0 %v2269_v28 }
 0x438   :  { %v868_v14 = vpop.f32.mrf.mxu0 }
 0x439   :  { %v869_v15 = vadd.f32 %v868_v14, %v1936_v56 }
 0x43a   :  { %v870_v13 = vpop.f32.mrf.mxu0 }
 0x43b   :  { %v2346_v17 = vadd.f32 %v870_v13, %v1938_v59  ;;  %1029 = vmatprep.mubr.f32.mxu1 %v869_v15 }
 0x43c   :  { %1030 = vmatmul.mubr.f32.vlgmr.msra.gmra.mxu1 %v897_v16 }
 0x43d   :  { %873 = vmax.xlane.f32.xlu0 %v2346_v17  ;;  %1292 = vmatpush1.msra.mxu1 %v2015_v18  ;;  %v2517_v18 = vld [vmem:[#allocation18_spill] sm:$0xff] }
 0x43e   :  { %1293 = vmatprep.subr.mxu1 %v2017_v19  ;;  %v2518_v19 = vld [vmem:[#allocation19_spill] sm:$0xff] }
 0x43f   :  { %1294 = vmatpush1.msra.mxu1 %v2020_v20  ;;  %v2519_v20 = vld [vmem:[#allocation20_spill] sm:$0xff] }
 0x440   :  { %1295 = vmatprep.subr.mxu1 %v2024_v21  ;;  %v2520_v21 = vld [vmem:[#allocation21_spill] sm:$0xff] }
 0x441   :  { %1296 = vmatpush1.msra.mxu1 %v2027_v22  ;;  %v2521_v22 = vld [vmem:[#allocation22_spill] sm:$0xff] }
 0x442   :  { %1297 = vmatprep.subr.mxu1 %v2030_v23  ;;  %v2522_v23 = vld [vmem:[#allocation23_spill] sm:$0xff] }
 0x443   :  { %1298 = vmatpush1.msra.mxu1 %v2046_v30 }
 0x444   :  { %1299 = vmatprep.subr.mxu1 %v2049_v31 }
 0x445   :  { %1300 = vmatpush1.msra.mxu1 %v2053_v32  ;;  %v1060_v32 = vld [vmem:[#allocation3 + $0x30] sm:$0xff] }
 0x446   :  { %1301 = vmatprep.subr.mxu1 %v2057_v33 }
 0x447   :  { %1302 = vmatpush1.msra.mxu1 %v2061_v34 }
 0x448   :  { %1303 = vmatprep.subr.mxu1 %v2065_v35  ;;  %v223_v35 = vpop.xlane.xlu0 %222 }
 0x449   :  { %1304 = vmatpush1.msra.mxu1 %v2067_v36  ;;  %v2523_v36 = vld [vmem:[#allocation27_spill] sm:$0xff] }
 0x44a   :  { %1305 = vmatprep.subr.mxu1 %v2069_v37  ;;  %v224_v37 = vsub.f32 %v2523_v36, %v223_v35 }
 0x44b   :  { %1306 = vmatpush1.msra.mxu1 %v2073_v38  ;;  %v548_v38 = vpop.xlane.xlu1 %547 }
 0x44c   :  { %1307 = vmatprep.subr.mxu1 %v2077_v39  ;;  %v225_v39 = vmul.f32 1.442695, %v224_v37 }
 0x44d   :  { %1308 = vmatpush1.msra.mxu1 %v2081_v40  ;;  %v2524_v40 = vld [vmem:[#allocation17_spill] sm:$0xff] }
 0x44e   :  { %1309 = vmatprep.subr.mxu1 %v2085_v41  ;;  %v549_v41 = vsub.f32 %v2524_v40, %v548_v38  ;;  %1421 = vpow2.f32 %v225_v39 }
 0x44f   :  { %1310 = vmatpush1.msra.mxu1 %v2089_v42 }
 0x450   :  { %1311 = vmatprep.subr.mxu1 %v2093_v43  ;;  %v550_v43 = vmul.f32 1.442695, %v549_v41 }
 0x451   :  { %1312 = vmatpush1.msra.mxu1 %v2097_v44 }
 0x452   :  { %1313 = vmatprep.subr.mxu1 %v2101_v45  ;;  %1423 = vpow2.f32 %v550_v43 }
 0x453   :  { %1314 = vmatpush1.msra.mxu1 %v2105_v46 }
 0x454   :  { %1315 = vmatprep.subr.mxu1 %v2109_v47 }
 0x455   :  { %1316 = vmatpush1.msra.mxu1 %v2113_v48  ;;  %v1223_v48 = vld [vmem:[#allocation3 + $0x38] sm:$0xff] }
 0x456   :  { %1317 = vmatprep.subr.mxu1 %v2117_v49 }
 0x457   :  { %1318 = vmatpush1.msra.mxu1 %v2121_v50 }
 0x458   :  { %1319 = vmatprep.subr.mxu1 %v2125_v51 }
 0x459   :  { %1320 = vmatpush1.msra.mxu1 %v2129_v52 }
 0x45a   :  { %1321 = vmatprep.subr.mxu1 %v2133_v53 }
 0x45b   :  { %1322 = vmatpush1.msra.mxu1 %v2137_v54  ;;  %v1422_v51 = vpop.eup %1421 }
 0x45c   :  { %1323 = vmatprep.subr.mxu1 %v2141_v55 }
 0x45d   :  { %1324 = vmatpush2.msra.mxu1 %v2145_v58 }
 0x45e   :  { %1325 = vmatprep.subr.mxu1 %v2149_v60 }
 0x45f   :  { %1326 = vmatpush2.msra.mxu1 %v2153_v61  ;;  %v1424_v52 = vpop.eup %1423 }
 0x460   :  { %1327 = vmatprep.subr.mxu1 %v2157_v62 }
 0x461   :  { %1328 = vmatpush2.msra.mxu1 %v2161_v24 }
 0x462   :  { %1329 = vmatprep.subr.mxu1 %v2165_v0 }
 0x463   :  { %1330 = vmatpush2.msra.mxu1 %v2169_v57 }
 0x464   :  { %1331 = vmatprep.subr.mxu1 %v2173_v1 }
 0x465   :  { %1332 = vmatpush2.msra.mxu1 %v2177_v2 }
 0x466   :  { %1333 = vmatprep.subr.mxu1 %v2181_v3 }
 0x467   :  { %1334 = vmatpush2.msra.mxu1 %v2185_v4 }
 0x468   :  { %1335 = vmatprep.subr.mxu1 %v2189_v5 }
 0x469   :  { %1336 = vmatpush2.msra.mxu1 %v2193_v6 }
 0x46a   :  { %1337 = vmatprep.subr.mxu1 %v2197_v7 }
 0x46b   :  { %1338 = vmatpush2.msra.mxu1 %v2201_v8  ;;  %v2525_v8 = vld [vmem:[#allocation16_spill] sm:$0xff] }
 0x46c   :  { %1339 = vmatprep.subr.mxu1 %v2205_v9 }
 0x46d   :  { %1340 = vmatpush2.msra.mxu1 %v2209_v10  ;;  %v711_v10 = vpop.xlane.xlu1 %710 }
 0x46e   :  { %1341 = vmatprep.subr.mxu1 %v2517_v18 }
 0x46f   :  { %1342 = vmatpush2.msra.mxu1 %v2217_v12  ;;  %v2526_v12 = vld [vmem:[#allocation30_spill] sm:$0xff] }
 0x470   :  { %1343 = vmatprep.subr.mxu1 %v2518_v19  ;;  %v712_v13 = vsub.f32 %v2526_v12, %v711_v10 }
 0x471   :  { %1344 = vmatpush2.msra.mxu1 %v2519_v20 }
 0x472   :  { %1345 = vmatprep.subr.mxu1 %v2520_v21  ;;  %v713_v15 = vmul.f32 1.442695, %v712_v13 }
 0x473   :  { %1346 = vmatpush2.msra.mxu1 %v2521_v22 }
 0x474   :  { %1347 = vmatprep.subr.mxu1 %v2522_v23 }
 0x475   :  { %1348 = vmatpush2.msra.mxu1 %v2512_v29 }
 0x476   :  { %1349 = vmatprep.subr.mxu1 %v2513_v25 }
 0x477   :  { %1350 = vmatpush2.msra.mxu1 %v2514_v27 }
 0x478   :  { %1351 = vmatprep.subr.mxu1 %v2515_v63  ;;  %v385_v63 = vpop.xlane.xlu0 %384 }
 0x479   :  { %1352 = vmatpush2.msra.mxu1 %v2516_v11  ;;  %v386_v9 = vsub.f32 %v2525_v8, %v385_v63 }
 0x47a   :  { %1353 = vmatprep.subr.mxu1 %v2265_v26 }
 0x47b   :  { %1354 = vmatpush2.msra.mxu1 %v2269_v28  ;;  %v387_v11 = vmul.f32 1.442695, %v386_v9 }
 0x4c6   :  { %v874_v42 = vpop.xlane.xlu0 %873 }
 0x4c7   :  { %v875_v44 = vsub.f32 %v2346_v17, %v874_v42 }
 0x4c9   :  { %v876_v45 = vmul.f32 1.442695, %v875_v44 }
 0x4cb   :  { %1425 = vpow2.f32 %v876_v45 }
 0x4d8   :  { %v1426_v53 = vpop.eup %1425 }
 0x4fc   :  { %v1031_v30 = vpop.f32.mrf.mxu1 }
 0x4fd   :  { %v1032_v31 = vadd.f32 %v1031_v30, %v1936_v56 }
 0x4fe   :  { %v1033_v33 = vpop.f32.mrf.mxu1 }
 0x4ff   :  { %v1034_v34 = vadd.f32 %v1033_v33, %v1938_v59  ;;  %1192 = vmatprep.mubr.f32.mxu0 %v1032_v31 }
 0x500   :  { %1193 = vmatmul.mubr.f32.vlgmr.msra.gmra.mxu0 %v1060_v32 }
 0x501   :  { %1036 = vmax.xlane.f32.xlu1 %v1034_v34 }
 0x58a   :  { %v1037_v14 = vpop.xlane.xlu1 %1036 }
 0x58b   :  { %v1038_v26 = vsub.f32 %v1034_v34, %v1037_v14 }
 0x58d   :  { %v1039_v28 = vmul.f32 1.442695, %v1038_v26 }
 0x5c0   :  { %v1194_v46 = vpop.f32.mrf.mxu0 }
 0x5c1   :  { %v1195_v47 = vadd.f32 %v1194_v46, %v1936_v56 }
 0x5c2   :  { %v1196_v49 = vpop.f32.mrf.mxu0 }
 0x5c3   :  { %v1197_v50 = vadd.f32 %v1196_v49, %v1938_v59  ;;  %1355 = vmatprep.mubr.f32.mxu1 %v1195_v47 }
 0x5c4   :  { %1356 = vmatmul.mubr.f32.vlgmr.msra.gmra.mxu1 %v1223_v48 }
 0x5c5   :  { %1199 = vmax.xlane.f32.xlu0 %v1197_v50 }
 0x5c9   :  { %227 = vadd.xlane.f32.xlu0 %v1422_v51 }
 0x5cd   :  { %552 = vadd.xlane.f32.xlu0 %v1424_v52 }
 0x5d1   :  { %878 = vadd.xlane.f32.xlu0 %v1426_v53 }
 0x64e   :  { %v1200_v54 = vpop.xlane.xlu0 %1199 }
 0x64f   :  { %v1201_v55 = vsub.f32 %v1197_v50, %v1200_v54 }
 0x651   :  { %v1202_v58 = vmul.f32 1.442695, %v1201_v55 }
 0x652   :  { %v228_v60 = vpop.xlane.xlu0 %227 }
 0x653   :  { %1427 = vpow2.f32 %v1202_v58 }
 0x654   :  { %1429 = vlog2.f32 %v228_v60 }
 0x656   :  { %v553_v61 = vpop.xlane.xlu0 %552 }
 0x657   :  { %1431 = vlog2.f32 %v553_v61 }
 0x65a   :  { %v879_v62 = vpop.xlane.xlu0 %878 }
 0x65b   :  { %1433 = vlog2.f32 %v879_v62 }
 0x65c   :  { %1435 = vpow2.f32 %v387_v11 }
 0x65d   :  { %1437 = vpow2.f32 %v713_v15 }
 0x65e   :  { %1439 = vpow2.f32 %v1039_v28 }
 0x660   :  { %v1428_v24 = vpop.eup %1427 }
 0x661   :  { %v1430_v0 = vpop.eup %1429  ;;  %1204 = vadd.xlane.f32.xlu0 %v1428_v24 }
 0x662   :  { %v230_v57 = vmul.f32 0.6931472, %v1430_v0 }
 0x664   :  { %v1432_v1 = vpop.eup %1431  ;;  %v231_v2 = vsub.f32 %v224_v37, %v230_v57 }
 0x665   :  { %v555_v3 = vmul.f32 0.6931472, %v1432_v1 }
 0x666   :  { %232 = vst [vmem:[#allocation9] sm:$0xff] %v231_v2 }
 0x667   :  { %v556_v4 = vsub.f32 %v549_v41, %v555_v3 }
 0x668   :  { %v1434_v5 = vpop.eup %1433 }
 0x669   :  { %558 = vst [vmem:[#allocation9 + $0x10] sm:$0xff] %v556_v4  ;;  %v881_v6 = vmul.f32 0.6931472, %v1434_v5  ;;  %v1436_v27 = vpop.eup %1435 }
 0x66a   :  { %v1438_v18 = vpop.eup %1437 }
 0x66b   :  { %v882_v7 = vsub.f32 %v875_v44, %v881_v6  ;;  %v1440_v19 = vpop.eup %1439 }
 0x66d   :  { %884 = vst [vmem:[#allocation9 + $0x20] sm:$0xff] %v882_v7 }
 0x684   :  { %v1357_v16 = vpop.f32.mrf.mxu1 }
 0x685   :  { %v1358_v17 = vadd.f32 %v1357_v16, %v1936_v56 }
 0x686   :  { %v1359_v29 = vpop.f32.mrf.mxu1 }
 0x687   :  { %1379 = vst [vmem:[#allocation10] sm:$0xff] %v1358_v17  ;;  %v1360_v25 = vadd.f32 %v1359_v29, %v1938_v59 }
 0x689   :  { %1362 = vmax.xlane.f32.xlu1 %v1360_v25 }
 0x68d   :  { %389 = vadd.xlane.f32.xlu1 %v1436_v27 }
 0x691   :  { %715 = vadd.xlane.f32.xlu1 %v1438_v18 }
 0x695   :  { %1041 = vadd.xlane.f32.xlu1 %v1440_v19 }
 0x6ea   :  { %v1205_v20 = vpop.xlane.xlu0 %1204 }
 0x6eb   :  { %1441 = vlog2.f32 %v1205_v20 }
 0x6f8   :  { %v1442_v21 = vpop.eup %1441 }
 0x6f9   :  { %v1207_v22 = vmul.f32 0.6931472, %v1442_v21 }
 0x6fb   :  { %v1208_v23 = vsub.f32 %v1201_v55, %v1207_v22 }
 0x6fd   :  { %1210 = vst [vmem:[#allocation9 + $0x30] sm:$0xff] %v1208_v23 }
 0x712   :  { %v1363_v30 = vpop.xlane.xlu1 %1362 }
 0x713   :  { %v1364_v56 = vsub.f32 %v1360_v25, %v1363_v30 }
 0x715   :  { %v1365_v31 = vmul.f32 1.442695, %v1364_v56 }
 0x716   :  { %v390_v32 = vpop.xlane.xlu1 %389 }
 0x717   :  { %1443 = vpow2.f32 %v1365_v31 }
 0x718   :  { %1445 = vlog2.f32 %v390_v32 }
 0x71a   :  { %v716_v59 = vpop.xlane.xlu1 %715 }
 0x71b   :  { %1447 = vlog2.f32 %v716_v59 }
 0x71e   :  { %v1042_v33 = vpop.xlane.xlu1 %1041 }
 0x71f   :  { %1449 = vlog2.f32 %v1042_v33 }
 0x724   :  { %v1444_v34 = vpop.eup %1443 }
 0x725   :  { %v1446_v35 = vpop.eup %1445  ;;  %1367 = vadd.xlane.f32.xlu1 %v1444_v34 }
 0x726   :  { %v392_v36 = vmul.f32 0.6931472, %v1446_v35 }
 0x728   :  { %v1448_v37 = vpop.eup %1447  ;;  %v393_v63 = vsub.f32 %v386_v9, %v392_v36 }
 0x729   :  { %v718_v38 = vmul.f32 0.6931472, %v1448_v37 }
 0x72a   :  { %395 = vst [vmem:[#allocation9 + $0x8] sm:$0xff] %v393_v63 }
 0x72b   :  { %v719_v39 = vsub.f32 %v712_v13, %v718_v38 }
 0x72c   :  { %v1450_v40 = vpop.eup %1449 }
 0x72d   :  { %721 = vst [vmem:[#allocation9 + $0x18] sm:$0xff] %v719_v39  ;;  %v1044_v41 = vmul.f32 0.6931472, %v1450_v40 }
 0x72f   :  { %v1045_v42 = vsub.f32 %v1038_v26, %v1044_v41 }
 0x731   :  { %1047 = vst [vmem:[#allocation9 + $0x28] sm:$0xff] %v1045_v42 }
 0x732   :  { %1524 = shalt.err (!%p1521_p5)
}
 0x733   :  { %1401 = dma.vmem_to_hbm [thread:$0]  %s1399_s11, 128, %s2437_s5, [#allocation11]  }
 0x734   :  { %s1569_s15 = smov [#allocation9]  }
 0x735   :  { %s1385_s16 = sshll.u32 %s1569_s15, 4  ;;  %s1386_s16 = int_to_ptr.vmem [resolvable:$true] %s1385_s16 }
 0x736   :  { %s1533_s17 = scalar_lea.vmem %s1386_s16, 1024  ;;  %p1538_p7 = scmp.lt.s32.totalorder %s1386_s16, %s1386_s16 }
 0x737   :  { %p1534_p6 = scmp.ne.s32.totalorder %s1386_s16, %s1533_s17  ;;  %p1539_p8 = scmp.lt.s32.totalorder %s1533_s17, %s1533_s17 }
 0x739   :  { %p1540_p9 = por %p1539_p8, %p1538_p7 }
 0x73b   :  { %p1541_p10 = pnand %p1540_p9, %p1534_p6 }
 0x7ae   :  { %v1368_v43 = vpop.xlane.xlu1 %1367 }
 0x7af   :  { %1451 = vlog2.f32 %v1368_v43 }
 0x7bc   :  { %v1452_v44 = vpop.eup %1451 }
 0x7bd   :  { %v1370_v45 = vmul.f32 0.6931472, %v1452_v44 }
 0x7bf   :  { %v1371_v46 = vsub.f32 %v1364_v56, %v1370_v45 }
 0x7c1   :  { %1373 = vst [vmem:[#allocation9 + $0x38] sm:$0xff] %v1371_v46 }
 0x7c2   :  { %1544 = shalt.err (!%p1541_p10)
}
 0x7c3   :  { %1391 = dma.vmem_to_hbm [thread:$0]  %s1386_s16, 1024, %s2436_s4, [#allocation5], %s1563_s26, %s1563_s26, %s1564_s27  }
 0x7c4   :  { %1557 = dma.done.wait [#allocation5], 1024  }
 0x7c5   :  { %1558 = vsyncadd [#allocation5], 4294966272 }
 0x7c6   :  { %1559 = dma.done.wait [#allocation11], 128  }
 0x7c7   :  { %1560 = vsyncadd [#allocation11], 4294967168 }
 0x7c8   :  { %1408 = vsyncpa [#allocation4], 1 }
 0x7c9   :  { %1409 = vsyncpa [#allocation7], 1 }
 0x7ca   :  { %1410 = vsyncpa [#allocation5], 1 }
 0x7cb   :  { %1411 = vsyncpa [#allocation11], 1 }

</bundles_post_ra>
